<compile_context>
chip_gen: v5e
topology: v5e:2x2
jax: 0.10.0
libtpu: 0.0.40
codegen_flags: <defaults>
</compile_context>

<pallas_src>
import functools

import jax
import jax.numpy as jnp
from jax import lax
from jax.experimental import pallas as pl
from jax.experimental.pallas import tpu as pltpu


# ----------------------------------------------------------------------------
# Pallas kernel: fused 9-tap stride-2 conv + bias + residual, one batch element
# per grid step.
# ----------------------------------------------------------------------------
def _pan_level_kernel(ee_ref, eo_ref, oe_ref, oo_ref, w_ref, b_ref, res_ref,
                      out_ref, *, Wh, L):
    # ee/eo/oe/oo_ref : (1, Hh*Wh, Cin) bf16  -- flattened stride-2 parity planes
    # w_ref           : (9, Cin, Cout)  bf16  -- per-tap weights (VMEM-resident)
    # b_ref           : (1, Cout)       f32   -- bias            (VMEM-resident)
    # res_ref         : (1, L, Cout)    bf16  -- residual, junk-col padded
    # out_ref         : (1, L, Cout)    f32
    parity = (ee_ref, eo_ref, oe_ref, oo_ref)

    # Accumulator starts at residual + bias: the 9 MXU matmuls then accumulate
    # straight on top and the epilogue is just a cast + store.
    acc = res_ref[0].astype(jnp.float32) + b_ref[...]

    for kh in range(3):
        for kw in range(3):
            src = parity[(kh % 2) * 2 + (kw % 2)]
            s = (kh // 2) * Wh + (kw // 2)          # static flat row offset
            tap = src[0, s:s + L, :]                # (L, Cin) bf16, contiguous
            acc = acc + jnp.dot(tap, w_ref[kh * 3 + kw],
                                preferred_element_type=jnp.float32)

    out_ref[0] = acc.astype(out_ref.dtype)


# ----------------------------------------------------------------------------
# One PAN level: conv3x3(stride=2, pad=1)(x) + residual, NHWC in / NHWC out.
# ----------------------------------------------------------------------------
def _pan_level_nhwc(x_nhwc, res_nhwc, w9, b2):
    N, H, W, Cin = x_nhwc.shape
    Cout = w9.shape[-1]
    OH = (H - 1) // 2 + 1
    OW = (W - 1) // 2 + 1
    Hp = H + 2 + ((H + 2) % 2)          # pad=1 each side, rounded up to even
    Wp = W + 2 + ((W + 2) % 2)
    Hh, Wh = Hp // 2, Wp // 2           # Hh = OH + 1, Wh = OW + 1
    L = (OH - 1) * Wh + OW              # flat matmul rows (valid + junk cols)

    x = jnp.pad(x_nhwc.astype(jnp.bfloat16),
                ((0, 0), (1, Hp - H - 1), (1, Wp - W - 1), (0, 0)))
    # Four stride-2 parity planes (exactly 1x the input bytes), flattened.
    ee = x[:, 0::2, 0::2, :].reshape(N, Hh * Wh, Cin)
    eo = x[:, 0::2, 1::2, :].reshape(N, Hh * Wh, Cin)
    oe = x[:, 1::2, 0::2, :].reshape(N, Hh * Wh, Cin)
    oo = x[:, 1::2, 1::2, :].reshape(N, Hh * Wh, Cin)

    # Residual in the same junk-column-padded flat layout as the accumulator.
    res = jnp.pad(res_nhwc.astype(jnp.bfloat16),
                  ((0, 0), (0, 0), (0, Wh - OW), (0, 0)))
    res = res.reshape(N, OH * Wh, Cout)[:, :L, :]

    kernel = functools.partial(_pan_level_kernel, Wh=Wh, L=L)
    out_flat = pl.pallas_call(
        kernel,
        out_shape=jax.ShapeDtypeStruct((N, L, Cout), jnp.float32),
        grid=(N,),
        in_specs=[
            pl.BlockSpec((1, Hh * Wh, Cin), lambda n: (n, 0, 0)),
            pl.BlockSpec((1, Hh * Wh, Cin), lambda n: (n, 0, 0)),
            pl.BlockSpec((1, Hh * Wh, Cin), lambda n: (n, 0, 0)),
            pl.BlockSpec((1, Hh * Wh, Cin), lambda n: (n, 0, 0)),
            pl.BlockSpec((9, Cin, Cout), lambda n: (0, 0, 0)),   # resident
            pl.BlockSpec((1, Cout), lambda n: (0, 0)),           # resident
            pl.BlockSpec((1, L, Cout), lambda n: (n, 0, 0)),
        ],
        out_specs=pl.BlockSpec((1, L, Cout), lambda n: (n, 0, 0)),
        compiler_params=pltpu.CompilerParams(
            dimension_semantics=("parallel",),
            vmem_limit_bytes=48 * 1024 * 1024),
    )(ee, eo, oe, oo, w9, b2, res)

    # Drop the junk column, restore (N, OH, OW, Cout) NHWC.
    out = jnp.pad(out_flat, ((0, 0), (0, OH * Wh - L), (0, 0)))
    return out.reshape(N, OH, Wh, Cout)[:, :, :OW, :]


# ----------------------------------------------------------------------------
# PAN module (PyTorch-compatible NCHW / OIHW interface)
# ----------------------------------------------------------------------------
def init_pan_params(planes, key):
    """Deterministic init matching PyTorch Conv2d default shapes/scale."""
    params = {}
    fan_in = planes * 3 * 3
    bound = 1.0 / jnp.sqrt(fan_in)
    for i, name in enumerate(["P3_down", "P4_down", "P5_down", "P6_down"]):
        kw_, kb_ = jax.random.split(jax.random.fold_in(key, i))
        params[name] = {
            "w": jax.random.uniform(kw_, (planes, planes, 3, 3),
                                    jnp.float32, -bound, bound),
            "b": jax.random.uniform(kb_, (planes,), jnp.float32, -bound, bound),
        }
    return params


def _prep_w(w_oihw):
    """(Cout, Cin, 3, 3) OIHW -> (9, Cin, Cout) per-tap, bf16 — done once."""
    Cout, Cin, _, _ = w_oihw.shape
    return jnp.transpose(w_oihw, (2, 3, 1, 0)).reshape(9, Cin, Cout).astype(
        jnp.bfloat16)


def _prep_b(b):
    return b.reshape(1, -1).astype(jnp.float32)


@jax.jit
def pan_forward(params, P3, P4, P5, P6, P7):
    to_nhwc = lambda t: jnp.transpose(t, (0, 2, 3, 1))
    to_nchw = lambda t: jnp.transpose(t, (0, 3, 1, 2))
    # NCHW -> NHWC once; all four levels chain in NHWC.
    p3, p4, p5, p6, p7 = map(to_nhwc, (P3, P4, P5, P6, P7))
    p4 = _pan_level_nhwc(p3, p4, _prep_w(params["P3_down"]["w"]),
                         _prep_b(params["P3_down"]["b"]))
    p5 = _pan_level_nhwc(p4, p5, _prep_w(params["P4_down"]["w"]),
                         _prep_b(params["P4_down"]["b"]))
    p6 = _pan_level_nhwc(p5, p6, _prep_w(params["P5_down"]["w"]),
                         _prep_b(params["P5_down"]["b"]))
    p7 = _pan_level_nhwc(p6, p7, _prep_w(params["P6_down"]["w"]),
                         _prep_b(params["P6_down"]["b"]))
    return [P3, to_nchw(p4), to_nchw(p5), to_nchw(p6), to_nchw(p7)]


# ----------------------------------------------------------------------------
# Pure-JAX f32 reference (lax.conv) for correctness checking
# ----------------------------------------------------------------------------
def _ref_conv_add(x, res, w, b):
    y = lax.conv_general_dilated(
        x, w, window_strides=(2, 2), padding=((1, 1), (1, 1)),
        dimension_numbers=("NCHW", "OIHW", "NCHW"))
    return y + b.reshape(1, -1, 1, 1) + res


def pan_forward_ref(params, P3, P4, P5, P6, P7):
    P4 = _ref_conv_add(P3, P4, params["P3_down"]["w"], params["P3_down"]["b"])
    P5 = _ref_conv_add(P4, P5, params["P4_down"]["w"], params["P4_down"]["b"])
    P6 = _ref_conv_add(P5, P6, params["P5_down"]["w"], params["P5_down"]["b"])
    P7 = _ref_conv_add(P6, P7, params["P6_down"]["w"], params["P6_down"]["b"])
    return [P3, P4, P5, P6, P7]


if __name__ == "__main__":
    key = jax.random.PRNGKey(0)
    planes, N = 8, 2
    params = init_pan_params(planes, jax.random.fold_in(key, 100))

    ks = jax.random.split(key, 5)
    P3 = jax.random.normal(ks[0], (N, planes, 16, 16), jnp.float32)
    P4 = jax.random.normal(ks[1], (N, planes, 8, 8), jnp.float32)
    P5 = jax.random.normal(ks[2], (N, planes, 4, 4), jnp.float32)
    P6 = jax.random.normal(ks[3], (N, planes, 2, 2), jnp.float32)
    P7 = jax.random.normal(ks[4], (N, planes, 1, 1), jnp.float32)

    outs = pan_forward(params, P3, P4, P5, P6, P7)
    outs = [jax.block_until_ready(o) for o in outs]

    refs = pan_forward_ref(params, P3, P4, P5, P6, P7)
    for o, r in zip(outs, refs):
        assert o.shape == r.shape, f"shape mismatch {o.shape} vs {r.shape}"
        # bf16 matmul/residual path -> loosened tolerance vs f32 reference.
        assert jnp.allclose(o, r, atol=5e-2, rtol=5e-2), "mismatch vs reference"

    print("KERNEL_OK")
</pallas_src>

<mosaic_0001>
module attributes {stable_mosaic.version = 11 : i64} {
  func.func @_pan_level_kernel(%arg0: i32, %arg1: memref<1x81x8xbf16, #tpu.memory_space<vmem>>, %arg2: memref<1x81x8xbf16, #tpu.memory_space<vmem>>, %arg3: memref<1x81x8xbf16, #tpu.memory_space<vmem>>, %arg4: memref<1x81x8xbf16, #tpu.memory_space<vmem>>, %arg5: memref<9x8x8xbf16, #tpu.memory_space<vmem>>, %arg6: memref<1x8xf32, #tpu.memory_space<vmem>>, %arg7: memref<1x71x8xbf16, #tpu.memory_space<vmem>>, %arg8: memref<1x71x8xf32, #tpu.memory_space<vmem>>) attributes {dimension_semantics = [#tpu.dimension_semantics<parallel>], iteration_bounds = array<i64: 2>, scalar_prefetch = 0 : i64, scratch_operands = 0 : i64, tpu.core_type = #tpu.core_type<tc>, window_params = [{transform_indices = @transform_0, window_bounds = array<i64: 1, 81, 8>}, {transform_indices = @transform_1, window_bounds = array<i64: 1, 81, 8>}, {transform_indices = @transform_2, window_bounds = array<i64: 1, 81, 8>}, {transform_indices = @transform_3, window_bounds = array<i64: 1, 81, 8>}, {pipeline_mode = #tpu.pipeline_mode<synchronous>, transform_indices = @transform_4, window_bounds = array<i64: 9, 8, 8>}, {pipeline_mode = #tpu.pipeline_mode<synchronous>, transform_indices = @transform_5, window_bounds = array<i64: 1, 8>}, {transform_indices = @transform_6, window_bounds = array<i64: 1, 71, 8>}, {transform_indices = @transform_7, window_bounds = array<i64: 1, 71, 8>}]} {
    %c0 = arith.constant 0 : index
    %c0_0 = arith.constant 0 : index
    %c0_1 = arith.constant 0 : index
    %0 = vector.load %arg7[%c0, %c0_0, %c0_1] : memref<1x71x8xbf16, #tpu.memory_space<vmem>>, vector<1x71x8xbf16>
    %1 = vector.shape_cast %0 : vector<1x71x8xbf16> to vector<71x8xbf16>
    %2 = arith.extf %1 : vector<71x8xbf16> to vector<71x8xf32>
    %c0_2 = arith.constant 0 : index
    %c0_3 = arith.constant 0 : index
    %3 = vector.load %arg6[%c0_2, %c0_3] : memref<1x8xf32, #tpu.memory_space<vmem>>, vector<1x8xf32>
    %4 = vector.broadcast %3 : vector<1x8xf32> to vector<71x8xf32>
    %5 = arith.addf %2, %4 : vector<71x8xf32>
    %c0_4 = arith.constant 0 : index
    %c0_5 = arith.constant 0 : index
    %c0_6 = arith.constant 0 : index
    %6 = vector.load %arg1[%c0_4, %c0_5, %c0_6] : memref<1x81x8xbf16, #tpu.memory_space<vmem>>, vector<1x71x8xbf16>
    %7 = vector.shape_cast %6 : vector<1x71x8xbf16> to vector<71x8xbf16>
    %c0_7 = arith.constant 0 : index
    %c0_8 = arith.constant 0 : index
    %c0_9 = arith.constant 0 : index
    %8 = vector.load %arg5[%c0_7, %c0_8, %c0_9] : memref<9x8x8xbf16, #tpu.memory_space<vmem>>, vector<1x8x8xbf16>
    %9 = vector.shape_cast %8 : vector<1x8x8xbf16> to vector<8x8xbf16>
    %cst = arith.constant dense<0.000000e+00> : vector<71x8xf32>
    %10 = tpu.matmul %7, %9, %cst {dimension_numbers = #tpu.dot_dimension_numbers<[1], [0], [0], [1], [0, 0, 1, 1], [], []>} : vector<71x8xbf16>, vector<8x8xbf16>, vector<71x8xf32> -> vector<71x8xf32>
    %11 = arith.addf %5, %10 : vector<71x8xf32>
    %c0_10 = arith.constant 0 : index
    %c0_11 = arith.constant 0 : index
    %c0_12 = arith.constant 0 : index
    %12 = vector.load %arg2[%c0_10, %c0_11, %c0_12] : memref<1x81x8xbf16, #tpu.memory_space<vmem>>, vector<1x71x8xbf16>
    %13 = vector.shape_cast %12 : vector<1x71x8xbf16> to vector<71x8xbf16>
    %c1 = arith.constant 1 : index
    %c0_13 = arith.constant 0 : index
    %c0_14 = arith.constant 0 : index
    %14 = vector.load %arg5[%c1, %c0_13, %c0_14] : memref<9x8x8xbf16, #tpu.memory_space<vmem>>, vector<1x8x8xbf16>
    %15 = vector.shape_cast %14 : vector<1x8x8xbf16> to vector<8x8xbf16>
    %cst_15 = arith.constant dense<0.000000e+00> : vector<71x8xf32>
    %16 = tpu.matmul %13, %15, %cst_15 {dimension_numbers = #tpu.dot_dimension_numbers<[1], [0], [0], [1], [0, 0, 1, 1], [], []>} : vector<71x8xbf16>, vector<8x8xbf16>, vector<71x8xf32> -> vector<71x8xf32>
    %17 = arith.addf %11, %16 : vector<71x8xf32>
    %c0_16 = arith.constant 0 : index
    %c1_17 = arith.constant 1 : index
    %c0_18 = arith.constant 0 : index
    %18 = vector.load %arg1[%c0_16, %c1_17, %c0_18] : memref<1x81x8xbf16, #tpu.memory_space<vmem>>, vector<1x71x8xbf16>
    %19 = vector.shape_cast %18 : vector<1x71x8xbf16> to vector<71x8xbf16>
    %c2 = arith.constant 2 : index
    %c0_19 = arith.constant 0 : index
    %c0_20 = arith.constant 0 : index
    %20 = vector.load %arg5[%c2, %c0_19, %c0_20] : memref<9x8x8xbf16, #tpu.memory_space<vmem>>, vector<1x8x8xbf16>
    %21 = vector.shape_cast %20 : vector<1x8x8xbf16> to vector<8x8xbf16>
    %cst_21 = arith.constant dense<0.000000e+00> : vector<71x8xf32>
    %22 = tpu.matmul %19, %21, %cst_21 {dimension_numbers = #tpu.dot_dimension_numbers<[1], [0], [0], [1], [0, 0, 1, 1], [], []>} : vector<71x8xbf16>, vector<8x8xbf16>, vector<71x8xf32> -> vector<71x8xf32>
    %23 = arith.addf %17, %22 : vector<71x8xf32>
    %c0_22 = arith.constant 0 : index
    %c0_23 = arith.constant 0 : index
    %c0_24 = arith.constant 0 : index
    %24 = vector.load %arg3[%c0_22, %c0_23, %c0_24] : memref<1x81x8xbf16, #tpu.memory_space<vmem>>, vector<1x71x8xbf16>
    %25 = vector.shape_cast %24 : vector<1x71x8xbf16> to vector<71x8xbf16>
    %c3 = arith.constant 3 : index
    %c0_25 = arith.constant 0 : index
    %c0_26 = arith.constant 0 : index
    %26 = vector.load %arg5[%c3, %c0_25, %c0_26] : memref<9x8x8xbf16, #tpu.memory_space<vmem>>, vector<1x8x8xbf16>
    %27 = vector.shape_cast %26 : vector<1x8x8xbf16> to vector<8x8xbf16>
    %cst_27 = arith.constant dense<0.000000e+00> : vector<71x8xf32>
    %28 = tpu.matmul %25, %27, %cst_27 {dimension_numbers = #tpu.dot_dimension_numbers<[1], [0], [0], [1], [0, 0, 1, 1], [], []>} : vector<71x8xbf16>, vector<8x8xbf16>, vector<71x8xf32> -> vector<71x8xf32>
    %29 = arith.addf %23, %28 : vector<71x8xf32>
    %c0_28 = arith.constant 0 : index
    %c0_29 = arith.constant 0 : index
    %c0_30 = arith.constant 0 : index
    %30 = vector.load %arg4[%c0_28, %c0_29, %c0_30] : memref<1x81x8xbf16, #tpu.memory_space<vmem>>, vector<1x71x8xbf16>
    %31 = vector.shape_cast %30 : vector<1x71x8xbf16> to vector<71x8xbf16>
    %c4 = arith.constant 4 : index
    %c0_31 = arith.constant 0 : index
    %c0_32 = arith.constant 0 : index
    %32 = vector.load %arg5[%c4, %c0_31, %c0_32] : memref<9x8x8xbf16, #tpu.memory_space<vmem>>, vector<1x8x8xbf16>
    %33 = vector.shape_cast %32 : vector<1x8x8xbf16> to vector<8x8xbf16>
    %cst_33 = arith.constant dense<0.000000e+00> : vector<71x8xf32>
    %34 = tpu.matmul %31, %33, %cst_33 {dimension_numbers = #tpu.dot_dimension_numbers<[1], [0], [0], [1], [0, 0, 1, 1], [], []>} : vector<71x8xbf16>, vector<8x8xbf16>, vector<71x8xf32> -> vector<71x8xf32>
    %35 = arith.addf %29, %34 : vector<71x8xf32>
    %c0_34 = arith.constant 0 : index
    %c1_35 = arith.constant 1 : index
    %c0_36 = arith.constant 0 : index
    %36 = vector.load %arg3[%c0_34, %c1_35, %c0_36] : memref<1x81x8xbf16, #tpu.memory_space<vmem>>, vector<1x71x8xbf16>
    %37 = vector.shape_cast %36 : vector<1x71x8xbf16> to vector<71x8xbf16>
    %c5 = arith.constant 5 : index
    %c0_37 = arith.constant 0 : index
    %c0_38 = arith.constant 0 : index
    %38 = vector.load %arg5[%c5, %c0_37, %c0_38] : memref<9x8x8xbf16, #tpu.memory_space<vmem>>, vector<1x8x8xbf16>
    %39 = vector.shape_cast %38 : vector<1x8x8xbf16> to vector<8x8xbf16>
    %cst_39 = arith.constant dense<0.000000e+00> : vector<71x8xf32>
    %40 = tpu.matmul %37, %39, %cst_39 {dimension_numbers = #tpu.dot_dimension_numbers<[1], [0], [0], [1], [0, 0, 1, 1], [], []>} : vector<71x8xbf16>, vector<8x8xbf16>, vector<71x8xf32> -> vector<71x8xf32>
    %41 = arith.addf %35, %40 : vector<71x8xf32>
    %c0_40 = arith.constant 0 : index
    %c9 = arith.constant 9 : index
    %c0_41 = arith.constant 0 : index
    %42 = vector.load %arg1[%c0_40, %c9, %c0_41] : memref<1x81x8xbf16, #tpu.memory_space<vmem>>, vector<1x71x8xbf16>
    %43 = vector.shape_cast %42 : vector<1x71x8xbf16> to vector<71x8xbf16>
    %c6 = arith.constant 6 : index
    %c0_42 = arith.constant 0 : index
    %c0_43 = arith.constant 0 : index
    %44 = vector.load %arg5[%c6, %c0_42, %c0_43] : memref<9x8x8xbf16, #tpu.memory_space<vmem>>, vector<1x8x8xbf16>
    %45 = vector.shape_cast %44 : vector<1x8x8xbf16> to vector<8x8xbf16>
    %cst_44 = arith.constant dense<0.000000e+00> : vector<71x8xf32>
    %46 = tpu.matmul %43, %45, %cst_44 {dimension_numbers = #tpu.dot_dimension_numbers<[1], [0], [0], [1], [0, 0, 1, 1], [], []>} : vector<71x8xbf16>, vector<8x8xbf16>, vector<71x8xf32> -> vector<71x8xf32>
    %47 = arith.addf %41, %46 : vector<71x8xf32>
    %c0_45 = arith.constant 0 : index
    %c9_46 = arith.constant 9 : index
    %c0_47 = arith.constant 0 : index
    %48 = vector.load %arg2[%c0_45, %c9_46, %c0_47] : memref<1x81x8xbf16, #tpu.memory_space<vmem>>, vector<1x71x8xbf16>
    %49 = vector.shape_cast %48 : vector<1x71x8xbf16> to vector<71x8xbf16>
    %c7 = arith.constant 7 : index
    %c0_48 = arith.constant 0 : index
    %c0_49 = arith.constant 0 : index
    %50 = vector.load %arg5[%c7, %c0_48, %c0_49] : memref<9x8x8xbf16, #tpu.memory_space<vmem>>, vector<1x8x8xbf16>
    %51 = vector.shape_cast %50 : vector<1x8x8xbf16> to vector<8x8xbf16>
    %cst_50 = arith.constant dense<0.000000e+00> : vector<71x8xf32>
    %52 = tpu.matmul %49, %51, %cst_50 {dimension_numbers = #tpu.dot_dimension_numbers<[1], [0], [0], [1], [0, 0, 1, 1], [], []>} : vector<71x8xbf16>, vector<8x8xbf16>, vector<71x8xf32> -> vector<71x8xf32>
    %53 = arith.addf %47, %52 : vector<71x8xf32>
    %c0_51 = arith.constant 0 : index
    %c10 = arith.constant 10 : index
    %c0_52 = arith.constant 0 : index
    %54 = vector.load %arg1[%c0_51, %c10, %c0_52] : memref<1x81x8xbf16, #tpu.memory_space<vmem>>, vector<1x71x8xbf16>
    %55 = vector.shape_cast %54 : vector<1x71x8xbf16> to vector<71x8xbf16>
    %c8 = arith.constant 8 : index
    %c0_53 = arith.constant 0 : index
    %c0_54 = arith.constant 0 : index
    %56 = vector.load %arg5[%c8, %c0_53, %c0_54] : memref<9x8x8xbf16, #tpu.memory_space<vmem>>, vector<1x8x8xbf16>
    %57 = vector.shape_cast %56 : vector<1x8x8xbf16> to vector<8x8xbf16>
    %cst_55 = arith.constant dense<0.000000e+00> : vector<71x8xf32>
    %58 = tpu.matmul %55, %57, %cst_55 {dimension_numbers = #tpu.dot_dimension_numbers<[1], [0], [0], [1], [0, 0, 1, 1], [], []>} : vector<71x8xbf16>, vector<8x8xbf16>, vector<71x8xf32> -> vector<71x8xf32>
    %59 = arith.addf %53, %58 : vector<71x8xf32>
    %c0_56 = arith.constant 0 : index
    %c0_57 = arith.constant 0 : index
    %c0_58 = arith.constant 0 : index
    %60 = vector.load %arg8[%c0_56, %c0_57, %c0_58] : memref<1x71x8xf32, #tpu.memory_space<vmem>>, vector<1x71x8xf32>
    %61 = vector.shape_cast %60 : vector<1x71x8xf32> to vector<71x8xf32>
    %62 = vector.shape_cast %59 : vector<71x8xf32> to vector<1x71x8xf32>
    tpu.vector_store %arg8[%c0_56, %c0_57, %c0_58], %62 {strides = array<i32>} : memref<1x71x8xf32, #tpu.memory_space<vmem>>, vector<1x71x8xf32>,
    return
  }
  func.func @transform_0(%arg0: i32) -> (i32, i32, i32) {
    %c0_i32 = arith.constant 0 : i32
    %c0_i32_0 = arith.constant 0 : i32
    %c0_i32_1 = arith.constant 0 : i32
    return %arg0, %c0_i32, %c0_i32_0 : i32, i32, i32
  }
  func.func @transform_1(%arg0: i32) -> (i32, i32, i32) {
    %c0_i32 = arith.constant 0 : i32
    %c0_i32_0 = arith.constant 0 : i32
    %c0_i32_1 = arith.constant 0 : i32
    return %arg0, %c0_i32, %c0_i32_0 : i32, i32, i32
  }
  func.func @transform_2(%arg0: i32) -> (i32, i32, i32) {
    %c0_i32 = arith.constant 0 : i32
    %c0_i32_0 = arith.constant 0 : i32
    %c0_i32_1 = arith.constant 0 : i32
    return %arg0, %c0_i32, %c0_i32_0 : i32, i32, i32
  }
  func.func @transform_3(%arg0: i32) -> (i32, i32, i32) {
    %c0_i32 = arith.constant 0 : i32
    %c0_i32_0 = arith.constant 0 : i32
    %c0_i32_1 = arith.constant 0 : i32
    return %arg0, %c0_i32, %c0_i32_0 : i32, i32, i32
  }
  func.func @transform_4(%arg0: i32) -> (i32, i32, i32) {
    %c0_i32 = arith.constant 0 : i32
    %c0_i32_0 = arith.constant 0 : i32
    %c0_i32_1 = arith.constant 0 : i32
    %c0_i32_2 = arith.constant 0 : i32
    return %c0_i32, %c0_i32_0, %c0_i32_1 : i32, i32, i32
  }
  func.func @transform_5(%arg0: i32) -> (i32, i32) {
    %c0_i32 = arith.constant 0 : i32
    %c0_i32_0 = arith.constant 0 : i32
    %c0_i32_1 = arith.constant 0 : i32
    return %c0_i32, %c0_i32_0 : i32, i32
  }
  func.func @transform_6(%arg0: i32) -> (i32, i32, i32) {
    %c0_i32 = arith.constant 0 : i32
    %c0_i32_0 = arith.constant 0 : i32
    %c0_i32_1 = arith.constant 0 : i32
    return %arg0, %c0_i32, %c0_i32_0 : i32, i32, i32
  }
  func.func @transform_7(%arg0: i32) -> (i32, i32, i32) {
    %c0_i32 = arith.constant 0 : i32
    %c0_i32_0 = arith.constant 0 : i32
    %c0_i32_1 = arith.constant 0 : i32
    return %arg0, %c0_i32, %c0_i32_0 : i32, i32, i32
  }
}

module attributes {stable_mosaic.version = 11 : i64} {
  func.func @_pan_level_kernel(%arg0: i32, %arg1: memref<1x25x8xbf16, #tpu.memory_space<vmem>>, %arg2: memref<1x25x8xbf16, #tpu.memory_space<vmem>>, %arg3: memref<1x25x8xbf16, #tpu.memory_space<vmem>>, %arg4: memref<1x25x8xbf16, #tpu.memory_space<vmem>>, %arg5: memref<9x8x8xbf16, #tpu.memory_space<vmem>>, %arg6: memref<1x8xf32, #tpu.memory_space<vmem>>, %arg7: memref<1x19x8xbf16, #tpu.memory_space<vmem>>, %arg8: memref<1x19x8xf32, #tpu.memory_space<vmem>>) attributes {dimension_semantics = [#tpu.dimension_semantics<parallel>], iteration_bounds = array<i64: 2>, scalar_prefetch = 0 : i64, scratch_operands = 0 : i64, tpu.core_type = #tpu.core_type<tc>, window_params = [{transform_indices = @transform_0, window_bounds = array<i64: 1, 25, 8>}, {transform_indices = @transform_1, window_bounds = array<i64: 1, 25, 8>}, {transform_indices = @transform_2, window_bounds = array<i64: 1, 25, 8>}, {transform_indices = @transform_3, window_bounds = array<i64: 1, 25, 8>}, {pipeline_mode = #tpu.pipeline_mode<synchronous>, transform_indices = @transform_4, window_bounds = array<i64: 9, 8, 8>}, {pipeline_mode = #tpu.pipeline_mode<synchronous>, transform_indices = @transform_5, window_bounds = array<i64: 1, 8>}, {transform_indices = @transform_6, window_bounds = array<i64: 1, 19, 8>}, {transform_indices = @transform_7, window_bounds = array<i64: 1, 19, 8>}]} {
    %c0 = arith.constant 0 : index
    %c0_0 = arith.constant 0 : index
    %c0_1 = arith.constant 0 : index
    %0 = vector.load %arg7[%c0, %c0_0, %c0_1] : memref<1x19x8xbf16, #tpu.memory_space<vmem>>, vector<1x19x8xbf16>
    %1 = vector.shape_cast %0 : vector<1x19x8xbf16> to vector<19x8xbf16>
    %2 = arith.extf %1 : vector<19x8xbf16> to vector<19x8xf32>
    %c0_2 = arith.constant 0 : index
    %c0_3 = arith.constant 0 : index
    %3 = vector.load %arg6[%c0_2, %c0_3] : memref<1x8xf32, #tpu.memory_space<vmem>>, vector<1x8xf32>
    %4 = vector.broadcast %3 : vector<1x8xf32> to vector<19x8xf32>
    %5 = arith.addf %2, %4 : vector<19x8xf32>
    %c0_4 = arith.constant 0 : index
    %c0_5 = arith.constant 0 : index
    %c0_6 = arith.constant 0 : index
    %6 = vector.load %arg1[%c0_4, %c0_5, %c0_6] : memref<1x25x8xbf16, #tpu.memory_space<vmem>>, vector<1x19x8xbf16>
    %7 = vector.shape_cast %6 : vector<1x19x8xbf16> to vector<19x8xbf16>
    %c0_7 = arith.constant 0 : index
    %c0_8 = arith.constant 0 : index
    %c0_9 = arith.constant 0 : index
    %8 = vector.load %arg5[%c0_7, %c0_8, %c0_9] : memref<9x8x8xbf16, #tpu.memory_space<vmem>>, vector<1x8x8xbf16>
    %9 = vector.shape_cast %8 : vector<1x8x8xbf16> to vector<8x8xbf16>
    %cst = arith.constant dense<0.000000e+00> : vector<19x8xf32>
    %10 = tpu.matmul %7, %9, %cst {dimension_numbers = #tpu.dot_dimension_numbers<[1], [0], [0], [1], [0, 0, 1, 1], [], []>} : vector<19x8xbf16>, vector<8x8xbf16>, vector<19x8xf32> -> vector<19x8xf32>
    %11 = arith.addf %5, %10 : vector<19x8xf32>
    %c0_10 = arith.constant 0 : index
    %c0_11 = arith.constant 0 : index
    %c0_12 = arith.constant 0 : index
    %12 = vector.load %arg2[%c0_10, %c0_11, %c0_12] : memref<1x25x8xbf16, #tpu.memory_space<vmem>>, vector<1x19x8xbf16>
    %13 = vector.shape_cast %12 : vector<1x19x8xbf16> to vector<19x8xbf16>
    %c1 = arith.constant 1 : index
    %c0_13 = arith.constant 0 : index
    %c0_14 = arith.constant 0 : index
    %14 = vector.load %arg5[%c1, %c0_13, %c0_14] : memref<9x8x8xbf16, #tpu.memory_space<vmem>>, vector<1x8x8xbf16>
    %15 = vector.shape_cast %14 : vector<1x8x8xbf16> to vector<8x8xbf16>
    %cst_15 = arith.constant dense<0.000000e+00> : vector<19x8xf32>
    %16 = tpu.matmul %13, %15, %cst_15 {dimension_numbers = #tpu.dot_dimension_numbers<[1], [0], [0], [1], [0, 0, 1, 1], [], []>} : vector<19x8xbf16>, vector<8x8xbf16>, vector<19x8xf32> -> vector<19x8xf32>
    %17 = arith.addf %11, %16 : vector<19x8xf32>
    %c0_16 = arith.constant 0 : index
    %c1_17 = arith.constant 1 : index
    %c0_18 = arith.constant 0 : index
    %18 = vector.load %arg1[%c0_16, %c1_17, %c0_18] : memref<1x25x8xbf16, #tpu.memory_space<vmem>>, vector<1x19x8xbf16>
    %19 = vector.shape_cast %18 : vector<1x19x8xbf16> to vector<19x8xbf16>
    %c2 = arith.constant 2 : index
    %c0_19 = arith.constant 0 : index
    %c0_20 = arith.constant 0 : index
    %20 = vector.load %arg5[%c2, %c0_19, %c0_20] : memref<9x8x8xbf16, #tpu.memory_space<vmem>>, vector<1x8x8xbf16>
    %21 = vector.shape_cast %20 : vector<1x8x8xbf16> to vector<8x8xbf16>
    %cst_21 = arith.constant dense<0.000000e+00> : vector<19x8xf32>
    %22 = tpu.matmul %19, %21, %cst_21 {dimension_numbers = #tpu.dot_dimension_numbers<[1], [0], [0], [1], [0, 0, 1, 1], [], []>} : vector<19x8xbf16>, vector<8x8xbf16>, vector<19x8xf32> -> vector<19x8xf32>
    %23 = arith.addf %17, %22 : vector<19x8xf32>
    %c0_22 = arith.constant 0 : index
    %c0_23 = arith.constant 0 : index
    %c0_24 = arith.constant 0 : index
    %24 = vector.load %arg3[%c0_22, %c0_23, %c0_24] : memref<1x25x8xbf16, #tpu.memory_space<vmem>>, vector<1x19x8xbf16>
    %25 = vector.shape_cast %24 : vector<1x19x8xbf16> to vector<19x8xbf16>
    %c3 = arith.constant 3 : index
    %c0_25 = arith.constant 0 : index
    %c0_26 = arith.constant 0 : index
    %26 = vector.load %arg5[%c3, %c0_25, %c0_26] : memref<9x8x8xbf16, #tpu.memory_space<vmem>>, vector<1x8x8xbf16>
    %27 = vector.shape_cast %26 : vector<1x8x8xbf16> to vector<8x8xbf16>
    %cst_27 = arith.constant dense<0.000000e+00> : vector<19x8xf32>
    %28 = tpu.matmul %25, %27, %cst_27 {dimension_numbers = #tpu.dot_dimension_numbers<[1], [0], [0], [1], [0, 0, 1, 1], [], []>} : vector<19x8xbf16>, vector<8x8xbf16>, vector<19x8xf32> -> vector<19x8xf32>
    %29 = arith.addf %23, %28 : vector<19x8xf32>
    %c0_28 = arith.constant 0 : index
    %c0_29 = arith.constant 0 : index
    %c0_30 = arith.constant 0 : index
    %30 = vector.load %arg4[%c0_28, %c0_29, %c0_30] : memref<1x25x8xbf16, #tpu.memory_space<vmem>>, vector<1x19x8xbf16>
    %31 = vector.shape_cast %30 : vector<1x19x8xbf16> to vector<19x8xbf16>
    %c4 = arith.constant 4 : index
    %c0_31 = arith.constant 0 : index
    %c0_32 = arith.constant 0 : index
    %32 = vector.load %arg5[%c4, %c0_31, %c0_32] : memref<9x8x8xbf16, #tpu.memory_space<vmem>>, vector<1x8x8xbf16>
    %33 = vector.shape_cast %32 : vector<1x8x8xbf16> to vector<8x8xbf16>
    %cst_33 = arith.constant dense<0.000000e+00> : vector<19x8xf32>
    %34 = tpu.matmul %31, %33, %cst_33 {dimension_numbers = #tpu.dot_dimension_numbers<[1], [0], [0], [1], [0, 0, 1, 1], [], []>} : vector<19x8xbf16>, vector<8x8xbf16>, vector<19x8xf32> -> vector<19x8xf32>
    %35 = arith.addf %29, %34 : vector<19x8xf32>
    %c0_34 = arith.constant 0 : index
    %c1_35 = arith.constant 1 : index
    %c0_36 = arith.constant 0 : index
    %36 = vector.load %arg3[%c0_34, %c1_35, %c0_36] : memref<1x25x8xbf16, #tpu.memory_space<vmem>>, vector<1x19x8xbf16>
    %37 = vector.shape_cast %36 : vector<1x19x8xbf16> to vector<19x8xbf16>
    %c5 = arith.constant 5 : index
    %c0_37 = arith.constant 0 : index
    %c0_38 = arith.constant 0 : index
    %38 = vector.load %arg5[%c5, %c0_37, %c0_38] : memref<9x8x8xbf16, #tpu.memory_space<vmem>>, vector<1x8x8xbf16>
    %39 = vector.shape_cast %38 : vector<1x8x8xbf16> to vector<8x8xbf16>
    %cst_39 = arith.constant dense<0.000000e+00> : vector<19x8xf32>
    %40 = tpu.matmul %37, %39, %cst_39 {dimension_numbers = #tpu.dot_dimension_numbers<[1], [0], [0], [1], [0, 0, 1, 1], [], []>} : vector<19x8xbf16>, vector<8x8xbf16>, vector<19x8xf32> -> vector<19x8xf32>
    %41 = arith.addf %35, %40 : vector<19x8xf32>
    %c0_40 = arith.constant 0 : index
    %c5_41 = arith.constant 5 : index
    %c0_42 = arith.constant 0 : index
    %42 = vector.load %arg1[%c0_40, %c5_41, %c0_42] : memref<1x25x8xbf16, #tpu.memory_space<vmem>>, vector<1x19x8xbf16>
    %43 = vector.shape_cast %42 : vector<1x19x8xbf16> to vector<19x8xbf16>
    %c6 = arith.constant 6 : index
    %c0_43 = arith.constant 0 : index
    %c0_44 = arith.constant 0 : index
    %44 = vector.load %arg5[%c6, %c0_43, %c0_44] : memref<9x8x8xbf16, #tpu.memory_space<vmem>>, vector<1x8x8xbf16>
    %45 = vector.shape_cast %44 : vector<1x8x8xbf16> to vector<8x8xbf16>
    %cst_45 = arith.constant dense<0.000000e+00> : vector<19x8xf32>
    %46 = tpu.matmul %43, %45, %cst_45 {dimension_numbers = #tpu.dot_dimension_numbers<[1], [0], [0], [1], [0, 0, 1, 1], [], []>} : vector<19x8xbf16>, vector<8x8xbf16>, vector<19x8xf32> -> vector<19x8xf32>
    %47 = arith.addf %41, %46 : vector<19x8xf32>
    %c0_46 = arith.constant 0 : index
    %c5_47 = arith.constant 5 : index
    %c0_48 = arith.constant 0 : index
    %48 = vector.load %arg2[%c0_46, %c5_47, %c0_48] : memref<1x25x8xbf16, #tpu.memory_space<vmem>>, vector<1x19x8xbf16>
    %49 = vector.shape_cast %48 : vector<1x19x8xbf16> to vector<19x8xbf16>
    %c7 = arith.constant 7 : index
    %c0_49 = arith.constant 0 : index
    %c0_50 = arith.constant 0 : index
    %50 = vector.load %arg5[%c7, %c0_49, %c0_50] : memref<9x8x8xbf16, #tpu.memory_space<vmem>>, vector<1x8x8xbf16>
    %51 = vector.shape_cast %50 : vector<1x8x8xbf16> to vector<8x8xbf16>
    %cst_51 = arith.constant dense<0.000000e+00> : vector<19x8xf32>
    %52 = tpu.matmul %49, %51, %cst_51 {dimension_numbers = #tpu.dot_dimension_numbers<[1], [0], [0], [1], [0, 0, 1, 1], [], []>} : vector<19x8xbf16>, vector<8x8xbf16>, vector<19x8xf32> -> vector<19x8xf32>
    %53 = arith.addf %47, %52 : vector<19x8xf32>
    %c0_52 = arith.constant 0 : index
    %c6_53 = arith.constant 6 : index
    %c0_54 = arith.constant 0 : index
    %54 = vector.load %arg1[%c0_52, %c6_53, %c0_54] : memref<1x25x8xbf16, #tpu.memory_space<vmem>>, vector<1x19x8xbf16>
    %55 = vector.shape_cast %54 : vector<1x19x8xbf16> to vector<19x8xbf16>
    %c8 = arith.constant 8 : index
    %c0_55 = arith.constant 0 : index
    %c0_56 = arith.constant 0 : index
    %56 = vector.load %arg5[%c8, %c0_55, %c0_56] : memref<9x8x8xbf16, #tpu.memory_space<vmem>>, vector<1x8x8xbf16>
    %57 = vector.shape_cast %56 : vector<1x8x8xbf16> to vector<8x8xbf16>
    %cst_57 = arith.constant dense<0.000000e+00> : vector<19x8xf32>
    %58 = tpu.matmul %55, %57, %cst_57 {dimension_numbers = #tpu.dot_dimension_numbers<[1], [0], [0], [1], [0, 0, 1, 1], [], []>} : vector<19x8xbf16>, vector<8x8xbf16>, vector<19x8xf32> -> vector<19x8xf32>
    %59 = arith.addf %53, %58 : vector<19x8xf32>
    %c0_58 = arith.constant 0 : index
    %c0_59 = arith.constant 0 : index
    %c0_60 = arith.constant 0 : index
    %60 = vector.load %arg8[%c0_58, %c0_59, %c0_60] : memref<1x19x8xf32, #tpu.memory_space<vmem>>, vector<1x19x8xf32>
    %61 = vector.shape_cast %60 : vector<1x19x8xf32> to vector<19x8xf32>
    %62 = vector.shape_cast %59 : vector<19x8xf32> to vector<1x19x8xf32>
    tpu.vector_store %arg8[%c0_58, %c0_59, %c0_60], %62 {strides = array<i32>} : memref<1x19x8xf32, #tpu.memory_space<vmem>>, vector<1x19x8xf32>,
    return
  }
  func.func @transform_0(%arg0: i32) -> (i32, i32, i32) {
    %c0_i32 = arith.constant 0 : i32
    %c0_i32_0 = arith.constant 0 : i32
    %c0_i32_1 = arith.constant 0 : i32
    return %arg0, %c0_i32, %c0_i32_0 : i32, i32, i32
  }
  func.func @transform_1(%arg0: i32) -> (i32, i32, i32) {
    %c0_i32 = arith.constant 0 : i32
    %c0_i32_0 = arith.constant 0 : i32
    %c0_i32_1 = arith.constant 0 : i32
    return %arg0, %c0_i32, %c0_i32_0 : i32, i32, i32
  }
  func.func @transform_2(%arg0: i32) -> (i32, i32, i32) {
    %c0_i32 = arith.constant 0 : i32
    %c0_i32_0 = arith.constant 0 : i32
    %c0_i32_1 = arith.constant 0 : i32
    return %arg0, %c0_i32, %c0_i32_0 : i32, i32, i32
  }
  func.func @transform_3(%arg0: i32) -> (i32, i32, i32) {
    %c0_i32 = arith.constant 0 : i32
    %c0_i32_0 = arith.constant 0 : i32
    %c0_i32_1 = arith.constant 0 : i32
    return %arg0, %c0_i32, %c0_i32_0 : i32, i32, i32
  }
  func.func @transform_4(%arg0: i32) -> (i32, i32, i32) {
    %c0_i32 = arith.constant 0 : i32
    %c0_i32_0 = arith.constant 0 : i32
    %c0_i32_1 = arith.constant 0 : i32
    %c0_i32_2 = arith.constant 0 : i32
    return %c0_i32, %c0_i32_0, %c0_i32_1 : i32, i32, i32
  }
  func.func @transform_5(%arg0: i32) -> (i32, i32) {
    %c0_i32 = arith.constant 0 : i32
    %c0_i32_0 = arith.constant 0 : i32
    %c0_i32_1 = arith.constant 0 : i32
    return %c0_i32, %c0_i32_0 : i32, i32
  }
  func.func @transform_6(%arg0: i32) -> (i32, i32, i32) {
    %c0_i32 = arith.constant 0 : i32
    %c0_i32_0 = arith.constant 0 : i32
    %c0_i32_1 = arith.constant 0 : i32
    return %arg0, %c0_i32, %c0_i32_0 : i32, i32, i32
  }
  func.func @transform_7(%arg0: i32) -> (i32, i32, i32) {
    %c0_i32 = arith.constant 0 : i32
    %c0_i32_0 = arith.constant 0 : i32
    %c0_i32_1 = arith.constant 0 : i32
    return %arg0, %c0_i32, %c0_i32_0 : i32, i32, i32
  }
}

module attributes {stable_mosaic.version = 11 : i64} {
  func.func @_pan_level_kernel(%arg0: i32, %arg1: memref<1x9x8xbf16, #tpu.memory_space<vmem>>, %arg2: memref<1x9x8xbf16, #tpu.memory_space<vmem>>, %arg3: memref<1x9x8xbf16, #tpu.memory_space<vmem>>, %arg4: memref<1x9x8xbf16, #tpu.memory_space<vmem>>, %arg5: memref<9x8x8xbf16, #tpu.memory_space<vmem>>, %arg6: memref<1x8xf32, #tpu.memory_space<vmem>>, %arg7: memref<1x5x8xbf16, #tpu.memory_space<vmem>>, %arg8: memref<1x5x8xf32, #tpu.memory_space<vmem>>) attributes {dimension_semantics = [#tpu.dimension_semantics<parallel>], iteration_bounds = array<i64: 2>, scalar_prefetch = 0 : i64, scratch_operands = 0 : i64, tpu.core_type = #tpu.core_type<tc>, window_params = [{transform_indices = @transform_0, window_bounds = array<i64: 1, 9, 8>}, {transform_indices = @transform_1, window_bounds = array<i64: 1, 9, 8>}, {transform_indices = @transform_2, window_bounds = array<i64: 1, 9, 8>}, {transform_indices = @transform_3, window_bounds = array<i64: 1, 9, 8>}, {pipeline_mode = #tpu.pipeline_mode<synchronous>, transform_indices = @transform_4, window_bounds = array<i64: 9, 8, 8>}, {pipeline_mode = #tpu.pipeline_mode<synchronous>, transform_indices = @transform_5, window_bounds = array<i64: 1, 8>}, {transform_indices = @transform_6, window_bounds = array<i64: 1, 5, 8>}, {transform_indices = @transform_7, window_bounds = array<i64: 1, 5, 8>}]} {
    %c0 = arith.constant 0 : index
    %c0_0 = arith.constant 0 : index
    %c0_1 = arith.constant 0 : index
    %0 = vector.load %arg7[%c0, %c0_0, %c0_1] : memref<1x5x8xbf16, #tpu.memory_space<vmem>>, vector<1x5x8xbf16>
    %1 = vector.shape_cast %0 : vector<1x5x8xbf16> to vector<5x8xbf16>
    %2 = arith.extf %1 : vector<5x8xbf16> to vector<5x8xf32>
    %c0_2 = arith.constant 0 : index
    %c0_3 = arith.constant 0 : index
    %3 = vector.load %arg6[%c0_2, %c0_3] : memref<1x8xf32, #tpu.memory_space<vmem>>, vector<1x8xf32>
    %4 = vector.broadcast %3 : vector<1x8xf32> to vector<5x8xf32>
    %5 = arith.addf %2, %4 : vector<5x8xf32>
    %c0_4 = arith.constant 0 : index
    %c0_5 = arith.constant 0 : index
    %c0_6 = arith.constant 0 : index
    %6 = vector.load %arg1[%c0_4, %c0_5, %c0_6] : memref<1x9x8xbf16, #tpu.memory_space<vmem>>, vector<1x5x8xbf16>
    %7 = vector.shape_cast %6 : vector<1x5x8xbf16> to vector<5x8xbf16>
    %c0_7 = arith.constant 0 : index
    %c0_8 = arith.constant 0 : index
    %c0_9 = arith.constant 0 : index
    %8 = vector.load %arg5[%c0_7, %c0_8, %c0_9] : memref<9x8x8xbf16, #tpu.memory_space<vmem>>, vector<1x8x8xbf16>
    %9 = vector.shape_cast %8 : vector<1x8x8xbf16> to vector<8x8xbf16>
    %cst = arith.constant dense<0.000000e+00> : vector<5x8xf32>
    %10 = tpu.matmul %7, %9, %cst {dimension_numbers = #tpu.dot_dimension_numbers<[1], [0], [0], [1], [0, 0, 1, 1], [], []>} : vector<5x8xbf16>, vector<8x8xbf16>, vector<5x8xf32> -> vector<5x8xf32>
    %11 = arith.addf %5, %10 : vector<5x8xf32>
    %c0_10 = arith.constant 0 : index
    %c0_11 = arith.constant 0 : index
    %c0_12 = arith.constant 0 : index
    %12 = vector.load %arg2[%c0_10, %c0_11, %c0_12] : memref<1x9x8xbf16, #tpu.memory_space<vmem>>, vector<1x5x8xbf16>
    %13 = vector.shape_cast %12 : vector<1x5x8xbf16> to vector<5x8xbf16>
    %c1 = arith.constant 1 : index
    %c0_13 = arith.constant 0 : index
    %c0_14 = arith.constant 0 : index
    %14 = vector.load %arg5[%c1, %c0_13, %c0_14] : memref<9x8x8xbf16, #tpu.memory_space<vmem>>, vector<1x8x8xbf16>
    %15 = vector.shape_cast %14 : vector<1x8x8xbf16> to vector<8x8xbf16>
    %cst_15 = arith.constant dense<0.000000e+00> : vector<5x8xf32>
    %16 = tpu.matmul %13, %15, %cst_15 {dimension_numbers = #tpu.dot_dimension_numbers<[1], [0], [0], [1], [0, 0, 1, 1], [], []>} : vector<5x8xbf16>, vector<8x8xbf16>, vector<5x8xf32> -> vector<5x8xf32>
    %17 = arith.addf %11, %16 : vector<5x8xf32>
    %c0_16 = arith.constant 0 : index
    %c1_17 = arith.constant 1 : index
    %c0_18 = arith.constant 0 : index
    %18 = vector.load %arg1[%c0_16, %c1_17, %c0_18] : memref<1x9x8xbf16, #tpu.memory_space<vmem>>, vector<1x5x8xbf16>
    %19 = vector.shape_cast %18 : vector<1x5x8xbf16> to vector<5x8xbf16>
    %c2 = arith.constant 2 : index
    %c0_19 = arith.constant 0 : index
    %c0_20 = arith.constant 0 : index
    %20 = vector.load %arg5[%c2, %c0_19, %c0_20] : memref<9x8x8xbf16, #tpu.memory_space<vmem>>, vector<1x8x8xbf16>
    %21 = vector.shape_cast %20 : vector<1x8x8xbf16> to vector<8x8xbf16>
    %cst_21 = arith.constant dense<0.000000e+00> : vector<5x8xf32>
    %22 = tpu.matmul %19, %21, %cst_21 {dimension_numbers = #tpu.dot_dimension_numbers<[1], [0], [0], [1], [0, 0, 1, 1], [], []>} : vector<5x8xbf16>, vector<8x8xbf16>, vector<5x8xf32> -> vector<5x8xf32>
    %23 = arith.addf %17, %22 : vector<5x8xf32>
    %c0_22 = arith.constant 0 : index
    %c0_23 = arith.constant 0 : index
    %c0_24 = arith.constant 0 : index
    %24 = vector.load %arg3[%c0_22, %c0_23, %c0_24] : memref<1x9x8xbf16, #tpu.memory_space<vmem>>, vector<1x5x8xbf16>
    %25 = vector.shape_cast %24 : vector<1x5x8xbf16> to vector<5x8xbf16>
    %c3 = arith.constant 3 : index
    %c0_25 = arith.constant 0 : index
    %c0_26 = arith.constant 0 : index
    %26 = vector.load %arg5[%c3, %c0_25, %c0_26] : memref<9x8x8xbf16, #tpu.memory_space<vmem>>, vector<1x8x8xbf16>
    %27 = vector.shape_cast %26 : vector<1x8x8xbf16> to vector<8x8xbf16>
    %cst_27 = arith.constant dense<0.000000e+00> : vector<5x8xf32>
    %28 = tpu.matmul %25, %27, %cst_27 {dimension_numbers = #tpu.dot_dimension_numbers<[1], [0], [0], [1], [0, 0, 1, 1], [], []>} : vector<5x8xbf16>, vector<8x8xbf16>, vector<5x8xf32> -> vector<5x8xf32>
    %29 = arith.addf %23, %28 : vector<5x8xf32>
    %c0_28 = arith.constant 0 : index
    %c0_29 = arith.constant 0 : index
    %c0_30 = arith.constant 0 : index
    %30 = vector.load %arg4[%c0_28, %c0_29, %c0_30] : memref<1x9x8xbf16, #tpu.memory_space<vmem>>, vector<1x5x8xbf16>
    %31 = vector.shape_cast %30 : vector<1x5x8xbf16> to vector<5x8xbf16>
    %c4 = arith.constant 4 : index
    %c0_31 = arith.constant 0 : index
    %c0_32 = arith.constant 0 : index
    %32 = vector.load %arg5[%c4, %c0_31, %c0_32] : memref<9x8x8xbf16, #tpu.memory_space<vmem>>, vector<1x8x8xbf16>
    %33 = vector.shape_cast %32 : vector<1x8x8xbf16> to vector<8x8xbf16>
    %cst_33 = arith.constant dense<0.000000e+00> : vector<5x8xf32>
    %34 = tpu.matmul %31, %33, %cst_33 {dimension_numbers = #tpu.dot_dimension_numbers<[1], [0], [0], [1], [0, 0, 1, 1], [], []>} : vector<5x8xbf16>, vector<8x8xbf16>, vector<5x8xf32> -> vector<5x8xf32>
    %35 = arith.addf %29, %34 : vector<5x8xf32>
    %c0_34 = arith.constant 0 : index
    %c1_35 = arith.constant 1 : index
    %c0_36 = arith.constant 0 : index
    %36 = vector.load %arg3[%c0_34, %c1_35, %c0_36] : memref<1x9x8xbf16, #tpu.memory_space<vmem>>, vector<1x5x8xbf16>
    %37 = vector.shape_cast %36 : vector<1x5x8xbf16> to vector<5x8xbf16>
    %c5 = arith.constant 5 : index
    %c0_37 = arith.constant 0 : index
    %c0_38 = arith.constant 0 : index
    %38 = vector.load %arg5[%c5, %c0_37, %c0_38] : memref<9x8x8xbf16, #tpu.memory_space<vmem>>, vector<1x8x8xbf16>
    %39 = vector.shape_cast %38 : vector<1x8x8xbf16> to vector<8x8xbf16>
    %cst_39 = arith.constant dense<0.000000e+00> : vector<5x8xf32>
    %40 = tpu.matmul %37, %39, %cst_39 {dimension_numbers = #tpu.dot_dimension_numbers<[1], [0], [0], [1], [0, 0, 1, 1], [], []>} : vector<5x8xbf16>, vector<8x8xbf16>, vector<5x8xf32> -> vector<5x8xf32>
    %41 = arith.addf %35, %40 : vector<5x8xf32>
    %c0_40 = arith.constant 0 : index
    %c3_41 = arith.constant 3 : index
    %c0_42 = arith.constant 0 : index
    %42 = vector.load %arg1[%c0_40, %c3_41, %c0_42] : memref<1x9x8xbf16, #tpu.memory_space<vmem>>, vector<1x5x8xbf16>
    %43 = vector.shape_cast %42 : vector<1x5x8xbf16> to vector<5x8xbf16>
    %c6 = arith.constant 6 : index
    %c0_43 = arith.constant 0 : index
    %c0_44 = arith.constant 0 : index
    %44 = vector.load %arg5[%c6, %c0_43, %c0_44] : memref<9x8x8xbf16, #tpu.memory_space<vmem>>, vector<1x8x8xbf16>
    %45 = vector.shape_cast %44 : vector<1x8x8xbf16> to vector<8x8xbf16>
    %cst_45 = arith.constant dense<0.000000e+00> : vector<5x8xf32>
    %46 = tpu.matmul %43, %45, %cst_45 {dimension_numbers = #tpu.dot_dimension_numbers<[1], [0], [0], [1], [0, 0, 1, 1], [], []>} : vector<5x8xbf16>, vector<8x8xbf16>, vector<5x8xf32> -> vector<5x8xf32>
    %47 = arith.addf %41, %46 : vector<5x8xf32>
    %c0_46 = arith.constant 0 : index
    %c3_47 = arith.constant 3 : index
    %c0_48 = arith.constant 0 : index
    %48 = vector.load %arg2[%c0_46, %c3_47, %c0_48] : memref<1x9x8xbf16, #tpu.memory_space<vmem>>, vector<1x5x8xbf16>
    %49 = vector.shape_cast %48 : vector<1x5x8xbf16> to vector<5x8xbf16>
    %c7 = arith.constant 7 : index
    %c0_49 = arith.constant 0 : index
    %c0_50 = arith.constant 0 : index
    %50 = vector.load %arg5[%c7, %c0_49, %c0_50] : memref<9x8x8xbf16, #tpu.memory_space<vmem>>, vector<1x8x8xbf16>
    %51 = vector.shape_cast %50 : vector<1x8x8xbf16> to vector<8x8xbf16>
    %cst_51 = arith.constant dense<0.000000e+00> : vector<5x8xf32>
    %52 = tpu.matmul %49, %51, %cst_51 {dimension_numbers = #tpu.dot_dimension_numbers<[1], [0], [0], [1], [0, 0, 1, 1], [], []>} : vector<5x8xbf16>, vector<8x8xbf16>, vector<5x8xf32> -> vector<5x8xf32>
    %53 = arith.addf %47, %52 : vector<5x8xf32>
    %c0_52 = arith.constant 0 : index
    %c4_53 = arith.constant 4 : index
    %c0_54 = arith.constant 0 : index
    %54 = vector.load %arg1[%c0_52, %c4_53, %c0_54] : memref<1x9x8xbf16, #tpu.memory_space<vmem>>, vector<1x5x8xbf16>
    %55 = vector.shape_cast %54 : vector<1x5x8xbf16> to vector<5x8xbf16>
    %c8 = arith.constant 8 : index
    %c0_55 = arith.constant 0 : index
    %c0_56 = arith.constant 0 : index
    %56 = vector.load %arg5[%c8, %c0_55, %c0_56] : memref<9x8x8xbf16, #tpu.memory_space<vmem>>, vector<1x8x8xbf16>
    %57 = vector.shape_cast %56 : vector<1x8x8xbf16> to vector<8x8xbf16>
    %cst_57 = arith.constant dense<0.000000e+00> : vector<5x8xf32>
    %58 = tpu.matmul %55, %57, %cst_57 {dimension_numbers = #tpu.dot_dimension_numbers<[1], [0], [0], [1], [0, 0, 1, 1], [], []>} : vector<5x8xbf16>, vector<8x8xbf16>, vector<5x8xf32> -> vector<5x8xf32>
    %59 = arith.addf %53, %58 : vector<5x8xf32>
    %c0_58 = arith.constant 0 : index
    %c0_59 = arith.constant 0 : index
    %c0_60 = arith.constant 0 : index
    %60 = vector.load %arg8[%c0_58, %c0_59, %c0_60] : memref<1x5x8xf32, #tpu.memory_space<vmem>>, vector<1x5x8xf32>
    %61 = vector.shape_cast %60 : vector<1x5x8xf32> to vector<5x8xf32>
    %62 = vector.shape_cast %59 : vector<5x8xf32> to vector<1x5x8xf32>
    tpu.vector_store %arg8[%c0_58, %c0_59, %c0_60], %62 {strides = array<i32>} : memref<1x5x8xf32, #tpu.memory_space<vmem>>, vector<1x5x8xf32>,
    return
  }
  func.func @transform_0(%arg0: i32) -> (i32, i32, i32) {
    %c0_i32 = arith.constant 0 : i32
    %c0_i32_0 = arith.constant 0 : i32
    %c0_i32_1 = arith.constant 0 : i32
    return %arg0, %c0_i32, %c0_i32_0 : i32, i32, i32
  }
  func.func @transform_1(%arg0: i32) -> (i32, i32, i32) {
    %c0_i32 = arith.constant 0 : i32
    %c0_i32_0 = arith.constant 0 : i32
    %c0_i32_1 = arith.constant 0 : i32
    return %arg0, %c0_i32, %c0_i32_0 : i32, i32, i32
  }
  func.func @transform_2(%arg0: i32) -> (i32, i32, i32) {
    %c0_i32 = arith.constant 0 : i32
    %c0_i32_0 = arith.constant 0 : i32
    %c0_i32_1 = arith.constant 0 : i32
    return %arg0, %c0_i32, %c0_i32_0 : i32, i32, i32
  }
  func.func @transform_3(%arg0: i32) -> (i32, i32, i32) {
    %c0_i32 = arith.constant 0 : i32
    %c0_i32_0 = arith.constant 0 : i32
    %c0_i32_1 = arith.constant 0 : i32
    return %arg0, %c0_i32, %c0_i32_0 : i32, i32, i32
  }
  func.func @transform_4(%arg0: i32) -> (i32, i32, i32) {
    %c0_i32 = arith.constant 0 : i32
    %c0_i32_0 = arith.constant 0 : i32
    %c0_i32_1 = arith.constant 0 : i32
    %c0_i32_2 = arith.constant 0 : i32
    return %c0_i32, %c0_i32_0, %c0_i32_1 : i32, i32, i32
  }
  func.func @transform_5(%arg0: i32) -> (i32, i32) {
    %c0_i32 = arith.constant 0 : i32
    %c0_i32_0 = arith.constant 0 : i32
    %c0_i32_1 = arith.constant 0 : i32
    return %c0_i32, %c0_i32_0 : i32, i32
  }
  func.func @transform_6(%arg0: i32) -> (i32, i32, i32) {
    %c0_i32 = arith.constant 0 : i32
    %c0_i32_0 = arith.constant 0 : i32
    %c0_i32_1 = arith.constant 0 : i32
    return %arg0, %c0_i32, %c0_i32_0 : i32, i32, i32
  }
  func.func @transform_7(%arg0: i32) -> (i32, i32, i32) {
    %c0_i32 = arith.constant 0 : i32
    %c0_i32_0 = arith.constant 0 : i32
    %c0_i32_1 = arith.constant 0 : i32
    return %arg0, %c0_i32, %c0_i32_0 : i32, i32, i32
  }
}

module attributes {stable_mosaic.version = 11 : i64} {
  func.func @_pan_level_kernel(%arg0: i32, %arg1: memref<1x4x8xbf16, #tpu.memory_space<vmem>>, %arg2: memref<1x4x8xbf16, #tpu.memory_space<vmem>>, %arg3: memref<1x4x8xbf16, #tpu.memory_space<vmem>>, %arg4: memref<1x4x8xbf16, #tpu.memory_space<vmem>>, %arg5: memref<9x8x8xbf16, #tpu.memory_space<vmem>>, %arg6: memref<1x8xf32, #tpu.memory_space<vmem>>, %arg7: memref<1x1x8xbf16, #tpu.memory_space<vmem>>, %arg8: memref<1x1x8xf32, #tpu.memory_space<vmem>>) attributes {dimension_semantics = [#tpu.dimension_semantics<parallel>], iteration_bounds = array<i64: 2>, scalar_prefetch = 0 : i64, scratch_operands = 0 : i64, tpu.core_type = #tpu.core_type<tc>, window_params = [{transform_indices = @transform_0, window_bounds = array<i64: 1, 4, 8>}, {transform_indices = @transform_1, window_bounds = array<i64: 1, 4, 8>}, {transform_indices = @transform_2, window_bounds = array<i64: 1, 4, 8>}, {transform_indices = @transform_3, window_bounds = array<i64: 1, 4, 8>}, {pipeline_mode = #tpu.pipeline_mode<synchronous>, transform_indices = @transform_4, window_bounds = array<i64: 9, 8, 8>}, {pipeline_mode = #tpu.pipeline_mode<synchronous>, transform_indices = @transform_5, window_bounds = array<i64: 1, 8>}, {transform_indices = @transform_6, window_bounds = array<i64: 1, 1, 8>}, {transform_indices = @transform_7, window_bounds = array<i64: 1, 1, 8>}]} {
    %c0 = arith.constant 0 : index
    %c0_0 = arith.constant 0 : index
    %c0_1 = arith.constant 0 : index
    %0 = vector.load %arg7[%c0, %c0_0, %c0_1] : memref<1x1x8xbf16, #tpu.memory_space<vmem>>, vector<1x1x8xbf16>
    %1 = vector.shape_cast %0 : vector<1x1x8xbf16> to vector<1x8xbf16>
    %2 = arith.extf %1 : vector<1x8xbf16> to vector<1x8xf32>
    %c0_2 = arith.constant 0 : index
    %c0_3 = arith.constant 0 : index
    %3 = vector.load %arg6[%c0_2, %c0_3] : memref<1x8xf32, #tpu.memory_space<vmem>>, vector<1x8xf32>
    %4 = arith.addf %2, %3 : vector<1x8xf32>
    %c0_4 = arith.constant 0 : index
    %c0_5 = arith.constant 0 : index
    %c0_6 = arith.constant 0 : index
    %5 = vector.load %arg1[%c0_4, %c0_5, %c0_6] : memref<1x4x8xbf16, #tpu.memory_space<vmem>>, vector<1x1x8xbf16>
    %6 = vector.shape_cast %5 : vector<1x1x8xbf16> to vector<1x8xbf16>
    %c0_7 = arith.constant 0 : index
    %c0_8 = arith.constant 0 : index
    %c0_9 = arith.constant 0 : index
    %7 = vector.load %arg5[%c0_7, %c0_8, %c0_9] : memref<9x8x8xbf16, #tpu.memory_space<vmem>>, vector<1x8x8xbf16>
    %8 = vector.shape_cast %7 : vector<1x8x8xbf16> to vector<8x8xbf16>
    %cst = arith.constant dense<0.000000e+00> : vector<1x8xf32>
    %9 = tpu.matmul %6, %8, %cst {dimension_numbers = #tpu.dot_dimension_numbers<[1], [0], [0], [1], [0, 0, 1, 1], [], []>} : vector<1x8xbf16>, vector<8x8xbf16>, vector<1x8xf32> -> vector<1x8xf32>
    %10 = arith.addf %4, %9 : vector<1x8xf32>
    %c0_10 = arith.constant 0 : index
    %c0_11 = arith.constant 0 : index
    %c0_12 = arith.constant 0 : index
    %11 = vector.load %arg2[%c0_10, %c0_11, %c0_12] : memref<1x4x8xbf16, #tpu.memory_space<vmem>>, vector<1x1x8xbf16>
    %12 = vector.shape_cast %11 : vector<1x1x8xbf16> to vector<1x8xbf16>
    %c1 = arith.constant 1 : index
    %c0_13 = arith.constant 0 : index
    %c0_14 = arith.constant 0 : index
    %13 = vector.load %arg5[%c1, %c0_13, %c0_14] : memref<9x8x8xbf16, #tpu.memory_space<vmem>>, vector<1x8x8xbf16>
    %14 = vector.shape_cast %13 : vector<1x8x8xbf16> to vector<8x8xbf16>
    %cst_15 = arith.constant dense<0.000000e+00> : vector<1x8xf32>
    %15 = tpu.matmul %12, %14, %cst_15 {dimension_numbers = #tpu.dot_dimension_numbers<[1], [0], [0], [1], [0, 0, 1, 1], [], []>} : vector<1x8xbf16>, vector<8x8xbf16>, vector<1x8xf32> -> vector<1x8xf32>
    %16 = arith.addf %10, %15 : vector<1x8xf32>
    %c0_16 = arith.constant 0 : index
    %c1_17 = arith.constant 1 : index
    %c0_18 = arith.constant 0 : index
    %17 = vector.load %arg1[%c0_16, %c1_17, %c0_18] : memref<1x4x8xbf16, #tpu.memory_space<vmem>>, vector<1x1x8xbf16>
    %18 = vector.shape_cast %17 : vector<1x1x8xbf16> to vector<1x8xbf16>
    %c2 = arith.constant 2 : index
    %c0_19 = arith.constant 0 : index
    %c0_20 = arith.constant 0 : index
    %19 = vector.load %arg5[%c2, %c0_19, %c0_20] : memref<9x8x8xbf16, #tpu.memory_space<vmem>>, vector<1x8x8xbf16>
    %20 = vector.shape_cast %19 : vector<1x8x8xbf16> to vector<8x8xbf16>
    %cst_21 = arith.constant dense<0.000000e+00> : vector<1x8xf32>
    %21 = tpu.matmul %18, %20, %cst_21 {dimension_numbers = #tpu.dot_dimension_numbers<[1], [0], [0], [1], [0, 0, 1, 1], [], []>} : vector<1x8xbf16>, vector<8x8xbf16>, vector<1x8xf32> -> vector<1x8xf32>
    %22 = arith.addf %16, %21 : vector<1x8xf32>
    %c0_22 = arith.constant 0 : index
    %c0_23 = arith.constant 0 : index
    %c0_24 = arith.constant 0 : index
    %23 = vector.load %arg3[%c0_22, %c0_23, %c0_24] : memref<1x4x8xbf16, #tpu.memory_space<vmem>>, vector<1x1x8xbf16>
    %24 = vector.shape_cast %23 : vector<1x1x8xbf16> to vector<1x8xbf16>
    %c3 = arith.constant 3 : index
    %c0_25 = arith.constant 0 : index
    %c0_26 = arith.constant 0 : index
    %25 = vector.load %arg5[%c3, %c0_25, %c0_26] : memref<9x8x8xbf16, #tpu.memory_space<vmem>>, vector<1x8x8xbf16>
    %26 = vector.shape_cast %25 : vector<1x8x8xbf16> to vector<8x8xbf16>
    %cst_27 = arith.constant dense<0.000000e+00> : vector<1x8xf32>
    %27 = tpu.matmul %24, %26, %cst_27 {dimension_numbers = #tpu.dot_dimension_numbers<[1], [0], [0], [1], [0, 0, 1, 1], [], []>} : vector<1x8xbf16>, vector<8x8xbf16>, vector<1x8xf32> -> vector<1x8xf32>
    %28 = arith.addf %22, %27 : vector<1x8xf32>
    %c0_28 = arith.constant 0 : index
    %c0_29 = arith.constant 0 : index
    %c0_30 = arith.constant 0 : index
    %29 = vector.load %arg4[%c0_28, %c0_29, %c0_30] : memref<1x4x8xbf16, #tpu.memory_space<vmem>>, vector<1x1x8xbf16>
    %30 = vector.shape_cast %29 : vector<1x1x8xbf16> to vector<1x8xbf16>
    %c4 = arith.constant 4 : index
    %c0_31 = arith.constant 0 : index
    %c0_32 = arith.constant 0 : index
    %31 = vector.load %arg5[%c4, %c0_31, %c0_32] : memref<9x8x8xbf16, #tpu.memory_space<vmem>>, vector<1x8x8xbf16>
    %32 = vector.shape_cast %31 : vector<1x8x8xbf16> to vector<8x8xbf16>
    %cst_33 = arith.constant dense<0.000000e+00> : vector<1x8xf32>
    %33 = tpu.matmul %30, %32, %cst_33 {dimension_numbers = #tpu.dot_dimension_numbers<[1], [0], [0], [1], [0, 0, 1, 1], [], []>} : vector<1x8xbf16>, vector<8x8xbf16>, vector<1x8xf32> -> vector<1x8xf32>
    %34 = arith.addf %28, %33 : vector<1x8xf32>
    %c0_34 = arith.constant 0 : index
    %c1_35 = arith.constant 1 : index
    %c0_36 = arith.constant 0 : index
    %35 = vector.load %arg3[%c0_34, %c1_35, %c0_36] : memref<1x4x8xbf16, #tpu.memory_space<vmem>>, vector<1x1x8xbf16>
    %36 = vector.shape_cast %35 : vector<1x1x8xbf16> to vector<1x8xbf16>
    %c5 = arith.constant 5 : index
    %c0_37 = arith.constant 0 : index
    %c0_38 = arith.constant 0 : index
    %37 = vector.load %arg5[%c5, %c0_37, %c0_38] : memref<9x8x8xbf16, #tpu.memory_space<vmem>>, vector<1x8x8xbf16>
    %38 = vector.shape_cast %37 : vector<1x8x8xbf16> to vector<8x8xbf16>
    %cst_39 = arith.constant dense<0.000000e+00> : vector<1x8xf32>
    %39 = tpu.matmul %36, %38, %cst_39 {dimension_numbers = #tpu.dot_dimension_numbers<[1], [0], [0], [1], [0, 0, 1, 1], [], []>} : vector<1x8xbf16>, vector<8x8xbf16>, vector<1x8xf32> -> vector<1x8xf32>
    %40 = arith.addf %34, %39 : vector<1x8xf32>
    %c0_40 = arith.constant 0 : index
    %c2_41 = arith.constant 2 : index
    %c0_42 = arith.constant 0 : index
    %41 = vector.load %arg1[%c0_40, %c2_41, %c0_42] : memref<1x4x8xbf16, #tpu.memory_space<vmem>>, vector<1x1x8xbf16>
    %42 = vector.shape_cast %41 : vector<1x1x8xbf16> to vector<1x8xbf16>
    %c6 = arith.constant 6 : index
    %c0_43 = arith.constant 0 : index
    %c0_44 = arith.constant 0 : index
    %43 = vector.load %arg5[%c6, %c0_43, %c0_44] : memref<9x8x8xbf16, #tpu.memory_space<vmem>>, vector<1x8x8xbf16>
    %44 = vector.shape_cast %43 : vector<1x8x8xbf16> to vector<8x8xbf16>
    %cst_45 = arith.constant dense<0.000000e+00> : vector<1x8xf32>
    %45 = tpu.matmul %42, %44, %cst_45 {dimension_numbers = #tpu.dot_dimension_numbers<[1], [0], [0], [1], [0, 0, 1, 1], [], []>} : vector<1x8xbf16>, vector<8x8xbf16>, vector<1x8xf32> -> vector<1x8xf32>
    %46 = arith.addf %40, %45 : vector<1x8xf32>
    %c0_46 = arith.constant 0 : index
    %c2_47 = arith.constant 2 : index
    %c0_48 = arith.constant 0 : index
    %47 = vector.load %arg2[%c0_46, %c2_47, %c0_48] : memref<1x4x8xbf16, #tpu.memory_space<vmem>>, vector<1x1x8xbf16>
    %48 = vector.shape_cast %47 : vector<1x1x8xbf16> to vector<1x8xbf16>
    %c7 = arith.constant 7 : index
    %c0_49 = arith.constant 0 : index
    %c0_50 = arith.constant 0 : index
    %49 = vector.load %arg5[%c7, %c0_49, %c0_50] : memref<9x8x8xbf16, #tpu.memory_space<vmem>>, vector<1x8x8xbf16>
    %50 = vector.shape_cast %49 : vector<1x8x8xbf16> to vector<8x8xbf16>
    %cst_51 = arith.constant dense<0.000000e+00> : vector<1x8xf32>
    %51 = tpu.matmul %48, %50, %cst_51 {dimension_numbers = #tpu.dot_dimension_numbers<[1], [0], [0], [1], [0, 0, 1, 1], [], []>} : vector<1x8xbf16>, vector<8x8xbf16>, vector<1x8xf32> -> vector<1x8xf32>
    %52 = arith.addf %46, %51 : vector<1x8xf32>
    %c0_52 = arith.constant 0 : index
    %c3_53 = arith.constant 3 : index
    %c0_54 = arith.constant 0 : index
    %53 = vector.load %arg1[%c0_52, %c3_53, %c0_54] : memref<1x4x8xbf16, #tpu.memory_space<vmem>>, vector<1x1x8xbf16>
    %54 = vector.shape_cast %53 : vector<1x1x8xbf16> to vector<1x8xbf16>
    %c8 = arith.constant 8 : index
    %c0_55 = arith.constant 0 : index
    %c0_56 = arith.constant 0 : index
    %55 = vector.load %arg5[%c8, %c0_55, %c0_56] : memref<9x8x8xbf16, #tpu.memory_space<vmem>>, vector<1x8x8xbf16>
    %56 = vector.shape_cast %55 : vector<1x8x8xbf16> to vector<8x8xbf16>
    %cst_57 = arith.constant dense<0.000000e+00> : vector<1x8xf32>
    %57 = tpu.matmul %54, %56, %cst_57 {dimension_numbers = #tpu.dot_dimension_numbers<[1], [0], [0], [1], [0, 0, 1, 1], [], []>} : vector<1x8xbf16>, vector<8x8xbf16>, vector<1x8xf32> -> vector<1x8xf32>
    %58 = arith.addf %52, %57 : vector<1x8xf32>
    %c0_58 = arith.constant 0 : index
    %c0_59 = arith.constant 0 : index
    %c0_60 = arith.constant 0 : index
    %59 = vector.load %arg8[%c0_58, %c0_59, %c0_60] : memref<1x1x8xf32, #tpu.memory_space<vmem>>, vector<1x1x8xf32>
    %60 = vector.shape_cast %59 : vector<1x1x8xf32> to vector<1x8xf32>
    %61 = vector.shape_cast %58 : vector<1x8xf32> to vector<1x1x8xf32>
    tpu.vector_store %arg8[%c0_58, %c0_59, %c0_60], %61 {strides = array<i32>} : memref<1x1x8xf32, #tpu.memory_space<vmem>>, vector<1x1x8xf32>,
    return
  }
  func.func @transform_0(%arg0: i32) -> (i32, i32, i32) {
    %c0_i32 = arith.constant 0 : i32
    %c0_i32_0 = arith.constant 0 : i32
    %c0_i32_1 = arith.constant 0 : i32
    return %arg0, %c0_i32, %c0_i32_0 : i32, i32, i32
  }
  func.func @transform_1(%arg0: i32) -> (i32, i32, i32) {
    %c0_i32 = arith.constant 0 : i32
    %c0_i32_0 = arith.constant 0 : i32
    %c0_i32_1 = arith.constant 0 : i32
    return %arg0, %c0_i32, %c0_i32_0 : i32, i32, i32
  }
  func.func @transform_2(%arg0: i32) -> (i32, i32, i32) {
    %c0_i32 = arith.constant 0 : i32
    %c0_i32_0 = arith.constant 0 : i32
    %c0_i32_1 = arith.constant 0 : i32
    return %arg0, %c0_i32, %c0_i32_0 : i32, i32, i32
  }
  func.func @transform_3(%arg0: i32) -> (i32, i32, i32) {
    %c0_i32 = arith.constant 0 : i32
    %c0_i32_0 = arith.constant 0 : i32
    %c0_i32_1 = arith.constant 0 : i32
    return %arg0, %c0_i32, %c0_i32_0 : i32, i32, i32
  }
  func.func @transform_4(%arg0: i32) -> (i32, i32, i32) {
    %c0_i32 = arith.constant 0 : i32
    %c0_i32_0 = arith.constant 0 : i32
    %c0_i32_1 = arith.constant 0 : i32
    %c0_i32_2 = arith.constant 0 : i32
    return %c0_i32, %c0_i32_0, %c0_i32_1 : i32, i32, i32
  }
  func.func @transform_5(%arg0: i32) -> (i32, i32) {
    %c0_i32 = arith.constant 0 : i32
    %c0_i32_0 = arith.constant 0 : i32
    %c0_i32_1 = arith.constant 0 : i32
    return %c0_i32, %c0_i32_0 : i32, i32
  }
  func.func @transform_6(%arg0: i32) -> (i32, i32, i32) {
    %c0_i32 = arith.constant 0 : i32
    %c0_i32_0 = arith.constant 0 : i32
    %c0_i32_1 = arith.constant 0 : i32
    return %arg0, %c0_i32, %c0_i32_0 : i32, i32, i32
  }
  func.func @transform_7(%arg0: i32) -> (i32, i32, i32) {
    %c0_i32 = arith.constant 0 : i32
    %c0_i32_0 = arith.constant 0 : i32
    %c0_i32_1 = arith.constant 0 : i32
    return %arg0, %c0_i32, %c0_i32_0 : i32, i32, i32
  }
}

</mosaic_0001>

<bundles_post_ra>
// kernel: pan_forward.4
= control target key start
LH: loop header
LB: loop body
LE: loop exit
PB: predicated region body
PF: predicated region fallthrough
CT: control target
= control target key end

     0   :  { %s1740_s24 = smov 0   ;;  %s2051_s0 = inlined_call_operand.vmem [shape: bf16[2,81,8], index: 0, kind: input, shape index: {}]   ;;  %s2052_s1 = inlined_call_operand.vmem [shape: bf16[2,81,8], index: 1, kind: input, shape index: {}]   ;;  %s2053_s2 = inlined_call_operand.vmem [shape: bf16[2,81,8], index: 2, kind: input, shape index: {}]   ;;  %s2054_s3 = inlined_call_operand.vmem [shape: bf16[2,81,8], index: 3, kind: input, shape index: {}]   ;;  %s2055_s4 = inlined_call_operand.vmem [shape: bf16[9,8,8], index: 4, kind: input, shape index: {}]   ;;  %s2056_s5 = inlined_call_operand.vmem [shape: f32[1,8], index: 5, kind: input, shape index: {}]   ;;  %s2057_s6 = inlined_call_operand.vmem [shape: bf16[2,71,8], index: 6, kind: input, shape index: {}]   ;;  %s2058_s7 = inlined_call_operand.vmem [shape: f32[2,71,8], index: 7, kind: output, shape index: {}]  }
   0x1 LB: > { %s1447_s25 = sadd.s32 4294967295, %s1698_s24   ;;  %p1451_p0 = scmp.ge.s32.totalorder %s1698_s24, 1  ;;  %s1698_s24 = sphi %s1740_s24, %s17_s24  }
   0x2   : > { %p277_p1 = scmp.lt.s32.totalorder %s1698_s24, 3 }
   0x4   : > { %p278_p2 = pnand %p1451_p0, %p277_p1 }
   0x5   : > { %p329_p3 = scmp.lt.s32.totalorder (!%p278_p2), %s1447_s25, 1 }
   0x6   : > { %281 = sbr.rel (%p278_p2) target bundleno = 335 (0x14f), region = 48 }
   0xb   : > { %v400_v0 = vld [vmem:[%s2055_s4] sm:$0xf]  ;;  %vm440_vm0 = vcmask 1043456   ;;  %v1501_v2 = vld [vmem:[%s2055_s4 + $0x8] sm:$0xf]  ;;  %s2060_s25 = smov (!%p329_p3, %s1447_s25), 1 }
   0xc   : > { %v442_v1 = vsel %vm440_vm0, %v400_v0, 0  ;;  %v1479_v3 = vld [vmem:[%s2055_s4 + $0x4] sm:$0xf]  ;;  %v633_v4 = vsel %vm440_vm0, %v1501_v2, 0  ;;  %v1507_v6 = vld [vmem:[%s2055_s4 + $0xc] sm:$0xf] }
   0xd   : > { %1677 = vmatpush.bf16.msra.mxu1 %v442_v1  ;;  %1678 = vmatpush.bf16.msra.mxu2 %v442_v1  ;;  %v536_v5 = vsel %vm440_vm0, %v1479_v3, 0  ;;  %v727_v7 = vsel %vm440_vm0, %v1507_v6, 0  ;;  %v1529_v8 = vld [vmem:[%s2055_s4 + $0x10] sm:$0xf]  ;;  %s1770_s13 = smul.u32 44, %s2060_s25  ;;  %vm424_vm1 = vcmask 64512  }
   0xe   : > { %1679 = vmatpush.bf16.msra.mxu3 %v442_v1  ;;  %451 = vmatpush.bf16.msra.mxu0 %v442_v1  ;;  %v821_v9 = vsel %vm440_vm0, %v1529_v8, 0  ;;  %v1557_v16 = vld [vmem:[%s2055_s4 + $0x18] sm:$0xf]  ;;  %v1579_v17 = vld [vmem:[%s2055_s4 + $0x1c] sm:$0xf]  ;;  %vm1264_vm3 = vcmask 1046528  }
   0xf   : > { %s1777_s16 = scalar_lea.vmem %s2051_s0, %s1770_s13  ;;  %v1050_v18 = vsel %vm440_vm0, %v1557_v16, 0  ;;  %v1551_v19 = vld [vmem:[%s2055_s4 + $0x14] sm:$0xf]  ;;  %v1183_v20 = vsel %vm440_vm0, %v1579_v17, 0  ;;  %v1601_v22 = vld [vmem:[%s2055_s4 + $0x20] sm:$0xf]  ;;  %s1810_s29 = scalar_lea.vmem %s2052_s1, %s1770_s13 }
  0x10   : > { %v1630_v10 = vld [vmem:[%s1777_s16 + $0x8] sm:$0xff]  ;;  %v1631_v11 = vld [vmem:[%s1777_s16 + $0x10] sm:$0xff]  ;;  %v399_v12 = vld [vmem:[%s1777_s16 + $0x20] sm:$0xf]  ;;  %v917_v21 = vsel %vm440_vm0, %v1551_v19, 0  ;;  %v1290_v23 = vsel %vm440_vm0, %v1601_v22, 0  ;;  %s1816_s9 = scalar_lea.vmem %s2054_s3, %s1770_s13  ;;  %s1824_s12 = scalar_lea.vmem %s2053_s2, %s1770_s13 }
  0x11   : > { %642 = vmatpush.bf16.msrb.mxu2 %v633_v4  ;;  %545 = vmatpush.bf16.msrb.mxu1 %v536_v5  ;;  %v418_v13 = vunpack.c.l.b16 %v399_v12  ;;  %v1629_v14 = vld [vmem:[%s1777_s16] sm:$0xff]  ;;  %v1632_v24 = vld [vmem:[%s1777_s16 + $0x18] sm:$0xff]  ;;  %v589_v31 = vshll.u32 %v1630_v10, 16  ;;  %vm582_vm2 = vsmask.f32 7424  ;;  %v1634_v34 = vld [vmem:[%s1810_s29 + $0x8] sm:$0xff] }
  0x12   : > { %736 = vmatpush.bf16.msrb.mxu3 %v727_v7  ;;  %830 = vmatpush.bf16.msrb.mxu0 %v821_v9  ;;  %v1633_v25 = vld [vmem:[%s1810_s29] sm:$0xff]  ;;  %v585_v28 = vshll.u32 %v1629_v14, 16  ;;  %v583_v29 = vshrl.u32 %v1629_v14, 16  ;;  %v1642_v36 = vld [vmem:[%s1816_s9 + $0x8] sm:$0xff]  ;;  %v593_v38 = vshrl.u32 %v1630_v10, 16  ;;  %v596_v39 = vshll.u32 %v1631_v11, 16 }
  0x13   : > { %1475 = vmatmul.msk.bf16.vlgmr.msra.gmra.mxu1 %vm424_vm1, %v1630_v10  ;;  %1476 = vmatmul.msk.bf16.vlgmr.msra.gmra.mxu2 %vm424_vm1, %v1631_v11  ;;  %v1785_v15 = vpack.c.b16 %v418_v13, %v418_v13  ;;  %v1641_v26 = vld [vmem:[%s1816_s9] sm:$0xff]  ;;  %v591_v33 = vrot.slane %v589_v31, 1  ;;  %v1839_v37 = vld [vmem:[%s1824_s12 + $0x8] sm:$0xff]  ;;  %v1635_v42 = vld [vmem:[%s1810_s29 + $0x10] sm:$0xff]  ;;  %v600_v46 = vshrl.u32 %v1631_v11, 16  ;;  %v603_v47 = vshll.u32 %v1632_v24, 16 }
  0x14   : > { %1474 = vmatmul.msk.bf16.vlgmr.msra.gmra.mxu0 %vm424_vm1, %v1629_v14  ;;  %v1828_v27 = vld [vmem:[%s1824_s12] sm:$0xff]  ;;  %v587_v30 = vrot.slane %v585_v28, 1  ;;  %v598_v41 = vrot.slane %v596_v39, 1  ;;  %v1643_v44 = vld [vmem:[%s1816_s9 + $0x10] sm:$0xff]  ;;  %v1636_v50 = vld [vmem:[%s1810_s29 + $0x18] sm:$0xff]  ;;  %v607_v55 = vshrl.u32 %v1632_v24, 16 }
  0x15   : > { %1478 = vmatmul.msk.bf16.vlgmr.msra.gmra.mxu3 %vm424_vm1, %v1785_v15  ;;  %1059 = vmatpush.bf16.msra.mxu2 %v1050_v18  ;;  %v595_v40 = vor.u32 %v593_v38, %v591_v33  ;;  %v1850_v45 = vld [vmem:[%s1824_s12 + $0x10] sm:$0xff]  ;;  %v605_v49 = vrot.slane %v603_v47, 1  ;;  %v1644_v52 = vld [vmem:[%s1816_s9 + $0x18] sm:$0xff]  ;;  %v1869_v54 = vld [vmem:[%s1810_s29 + $0x20] sm:$0xff]   ;;  %v610_v56 = vshll.u32 %v1785_v15, 16  ;;  %v869_v5 = vshll.u32 %v1828_v27, 16 }
  0x16   : > { %1192 = vmatpush.bf16.msra.mxu3 %v1183_v20  ;;  %926 = vmatpush.bf16.msra.mxu1 %v917_v21  ;;  %v588_v32 = vor.u32 %v587_v30, %v583_v29  ;;  %v602_v48 = vor.u32 %v600_v46, %v598_v41  ;;  %v1861_v53 = vld [vmem:[%s1824_s12 + $0x18] sm:$0xff]  ;;  %v779_v57 = vld [vmem:[%s1816_s9 + $0x20] sm:$0xf]  ;;  %v514_v58 = vunpack.c.l.b16 %v1869_v54  ;;  %v1649_v4 = vld [vmem:[%s1810_s29 + $0x4] sm:$0xff]  ;;  %v867_v10 = vshrl.u32 %v1828_v27, 16  ;;  %s1681_s13 = smul.u32 36, %s2060_s25 }
  0x17   : > { %1299 = vmatpush.bf16.msra.mxu0 %v1290_v23  ;;  %v599_v43 = vsel %vm582_vm2, %v595_v40, %v598_v41  ;;  %v685_v59 = vld [vmem:[%s1824_s12 + $0x20] sm:$0xf]  ;;  %v609_v60 = vor.u32 %v607_v55, %v605_v49  ;;  %v612_v61 = vrot.slane %v610_v56, 1  ;;  %v799_v62 = vunpack.c.l.b16 %v779_v57  ;;  %v1604_v6 = vld [vmem:[%s1777_s16 + $0x4] sm:$0xe]  ;;  %v1650_v8 = vld [vmem:[%s1810_s29 + $0xc] sm:$0xff] }
  0x18   : > { %v592_v35 = vsel %vm582_vm2, %v588_v32, %v591_v33  ;;  %v606_v51 = vsel %vm582_vm2, %v602_v48, %v605_v49  ;;  %v705_v63 = vunpack.c.l.b16 %v685_v59  ;;  %v519_v0 = vpack.c.b16 %v514_v58, %v514_v58  ;;  %v1653_v7 = vld [vmem:[%s1777_s16 + $0x4] sm:$0xf0]  ;;  %v1654_v13 = vld [vmem:[%s1777_s16 + $0xc] sm:$0xff]  ;;  %v1651_v33 = vld [vmem:[%s1810_s29 + $0x14] sm:$0xff]  ;;  %s1909_s17 = scalar_lea.vmem %s2057_s6, %s1681_s13 }
  0x19   : > { %v613_v1 = vsel %vm582_vm2, %v609_v60, %v612_v61  ;;  %v804_v2 = vpack.c.b16 %v799_v62, %v799_v62  ;;  %v1131_v9 = vshll.u32 %v1649_v4, 16  ;;  %v873_v11 = vshll.u32 %v1839_v37, 16  ;;  %v1645_v28 = vld [vmem:[%s1777_s16 + $0x4] sm:$0xff]  ;;  %v1646_v30 = vld [vmem:[%s1777_s16 + $0xc] sm:$0xff]  ;;  %v1655_v39 = vld [vmem:[%s1777_s16 + $0x14] sm:$0xff] }
  0x1a   : > { %v1876_v3 = vpack.c.b16 %v705_v63, %v705_v63  ;;  %v871_v12 = vrot.slane %v869_v5, 1  ;;  %v1605_v14 = vor.u32 %v1653_v7, %v1604_v6  ;;  %v614_v16 = vshrl.u32 %v1785_v15, 16  ;;  %v368_v49 = vld [vmem:[%s1909_s17 + $0x20] sm:$0xf]  ;;  %v1647_v59 = vld [vmem:[%s1777_s16 + $0x14] sm:$0xff] }
  0x1b   : > { %v1129_v17 = vshrl.u32 %v1649_v4, 16  ;;  %v1133_v18 = vrot.slane %v1131_v9, 1  ;;  %v1136_v19 = vshll.u32 %v1650_v8, 16  ;;  %v875_v20 = vrot.slane %v873_v11, 1  ;;  %v1652_v60 = vld [vmem:[%s1810_s29 + $0x1c] sm:$0xff] }
  0x1c   : > { %v872_v21 = vor.u32 %v871_v12, %v867_v10  ;;  %v1265_v22 = vrot.slane %v1605_v14, 1  ;;  %v1266_v23 = vrot.slane %v1654_v13, 1  ;;  %v998_v31 = vshll.u32 %v1645_v28, 16 }
  0x1d   : > { %v877_v32 = vshrl.u32 %v1839_v37, 16  ;;  %v1003_v38 = vshll.u32 %v1646_v30, 16  ;;  %v1140_v40 = vshrl.u32 %v1650_v8, 16  ;;  %v1144_v41 = vshll.u32 %v1651_v33, 16 }
  0x1e   : > { %v1267_v15 = vsel %vm1264_vm3, %v1265_v22, %v1266_v23  ;;  %v1268_v47 = vrot.slane %v1655_v39, 1  ;;  %v377_v55 = vunpack.c.l.bf16 %v368_v49  ;;  %v887_v62 = vshll.u32 %v1861_v53, 16 }
  0x1f   : > { %v1005_v46 = vrot.slane %v1003_v38, 1  ;;  %v1146_v48 = vrot.slane %v1144_v41, 1  ;;  %v1007_v63 = vshrl.u32 %v1646_v30, 16  ;;  %v1152_v4 = vshll.u32 %v1652_v60, 16 }
  0x20   : > { %v1269_v56 = vsel %vm1264_vm3, %v1266_v23, %v1268_v47  ;;  %v889_v6 = vrot.slane %v887_v62, 1  ;;  %v1620_v23 = vld [vmem:[%s1777_s16 + $0x24] sm:$0xf]  ;;  %vm1342_vm4 = vcmask 63488  }
  0x21   : > { %v1009_v7 = vor.u32 %v1007_v63, %v1005_v46  ;;  %v1154_v11 = vrot.slane %v1152_v4, 1 }
  0x23   : > { %1477 = vmatmul.msk.bf16.gmra.mxu2 %vm424_vm1, %v1632_v24  ;;  %1496 = vmatmul.msk.bf16.vlgmr.msrb.gmra.mxu1 %vm424_vm1, %v1633_v25  ;;  %v616_v24 = vor.u32 %v614_v16, %v612_v61  ;;  %v1134_v25 = vor.u32 %v1133_v18, %v1129_v17  ;;  %v884_v61 = vshrl.u32 %v1850_v45, 16  ;;  %v1659_v17 = vld [vmem:[%s1909_s17] sm:$0xff]  }
  0x24   : > { %1546 = vmatmul.msk.bf16.vlgmr.msrb.gmra.mxu0 %vm424_vm1, %v1641_v26  ;;  %v1138_v26 = vrot.slane %v1136_v19, 1  ;;  %v1122_v19 = vunpack.c.h.b16 %v1869_v54  ;;  %v1661_v41 = vunpack.c.h.bf16 %v1659_v17 }
  0x25   : > { %1524 = vmatmul.msk.bf16.vlgmr.msrb.gmra.mxu3 %vm424_vm1, %v1828_v27  ;;  %v876_v27 = vsel %vm582_vm2, %v872_v21, %v875_v20  ;;  %v1660_v21 = vunpack.c.l.bf16 %v1659_v17 }
  0x26   : > { %v1139_v29 = vsel %vm582_vm2, %v1134_v25, %v1138_v26  ;;  %v1948_v25 = vpack.c.b16 %v1122_v19, %v1122_v19 }
  0x33   : > { %1497 = vmatmul.msk.bf16.gmra.mxu1 %vm424_vm1, %v1634_v34  ;;  %1502 = vmatmul.msk.bf16.vlgmr.msrb.gmra.mxu2 %vm424_vm1, %v592_v35  ;;  %v880_v34 = vshll.u32 %v1850_v45, 16  ;;  %v996_v35 = vshrl.u32 %v1645_v28, 16  ;;  %v894_v28 = vshll.u32 %v1876_v3, 16 }
  0x34   : > { %1547 = vmatmul.msk.bf16.gmra.mxu0 %vm424_vm1, %v1642_v36  ;;  %v1000_v36 = vrot.slane %v998_v31, 1 }
  0x35   : > { %1525 = vmatmul.msk.bf16.gmra.mxu3 %vm424_vm1, %v1839_v37  ;;  %v1142_v37 = vor.u32 %v1140_v40, %v1138_v26  ;;  %v896_v38 = vrot.slane %v894_v28, 1 }
  0x37   : > { %v1147_v58 = vsel %vm582_vm2, %v1142_v37, %v1146_v48 }
  0x43   : > { %1498 = vmatmul.msk.bf16.gmra.mxu1 %vm424_vm1, %v1635_v42  ;;  %1503 = vmatmul.msk.bf16.gmra.mxu2 %vm424_vm1, %v599_v43  ;;  %v879_v42 = vor.u32 %v877_v32, %v875_v20  ;;  %v882_v43 = vrot.slane %v880_v34, 1  ;;  %v1648_v20 = vld [vmem:[%s1777_s16 + $0x1c] sm:$0xff]  ;;  %v1156_v34 = vshrl.u32 %v1652_v60, 16  ;;  %v1674_v60 = vld [vmem:[%s1909_s17 + $0x8] sm:$0xff]  }
  0x44   : > { %1548 = vmatmul.msk.bf16.gmra.mxu0 %vm424_vm1, %v1643_v44  ;;  %v1001_v44 = vor.u32 %v1000_v36, %v996_v35  ;;  %v1019_v54 = vshll.u32 %v1648_v20, 16  ;;  %v1160_v35 = vshll.u32 %v1948_v25, 16 }
  0x45   : > { %1526 = vmatmul.msk.bf16.gmra.mxu3 %vm424_vm1, %v1850_v45  ;;  %v886_v5 = vor.u32 %v884_v61, %v882_v43 }
  0x46   : > { %v1021_v40 = vrot.slane %v1019_v54, 1 }
  0x47   : > { %v890_v45 = vsel %vm582_vm2, %v886_v5, %v889_v6 }
  0x53   : > { %1499 = vmatmul.msk.bf16.gmra.mxu1 %vm424_vm1, %v1636_v50  ;;  %1504 = vmatmul.msk.bf16.gmra.mxu2 %vm424_vm1, %v606_v51  ;;  %v883_v50 = vsel %vm582_vm2, %v879_v42, %v882_v43  ;;  %v1006_v51 = vsel %vm582_vm2, %v1001_v44, %v1005_v46  ;;  %v969_v43 = vld [vmem:[%s1777_s16 + $0x24] sm:$0xf]  ;;  %v1158_v46 = vor.u32 %v1156_v34, %v1154_v11 }
  0x54   : > { %1549 = vmatmul.msk.bf16.gmra.mxu0 %vm424_vm1, %v1644_v52  ;;  %v1917_v52 = vld [vmem:[%s2056_s5] ss:$0 sm:$0xff] }
  0x55   : > { %1527 = vmatmul.msk.bf16.gmra.mxu3 %vm424_vm1, %v1861_v53  ;;  %v390_v57 = vadd.f32 %v1917_v52, %v377_v55  ;;  %v383_v55 = vadd.f32 %v1917_v52, %v1661_v41 }
  0x63   : > { %1500 = vmatmul.msk.bf16.gmra.mxu1 %vm424_vm1, %v519_v0  ;;  %1505 = vmatmul.msk.bf16.gmra.mxu2 %vm424_vm1, %v613_v1  ;;  %v1011_v0 = vshll.u32 %v1647_v59, 16  ;;  %v1656_v1 = vld [vmem:[%s1777_s16 + $0x1c] sm:$0xff] }
  0x64   : > { %1550 = vmatmul.msk.bf16.gmra.mxu0 %vm424_vm1, %v804_v2  ;;  %v1148_v2 = vshrl.u32 %v1651_v33, 16  ;;  %v1270_v9 = vrot.slane %v1656_v1, 1 }
  0x65   : > { %1528 = vmatmul.msk.bf16.gmra.mxu3 %vm424_vm1, %v1876_v3  ;;  %v1013_v8 = vrot.slane %v1011_v0, 1  ;;  %v1664_v0 = vunpack.c.l.bf16 %v1674_v60 }
  0x66   : > { %v1150_v10 = vor.u32 %v1148_v2, %v1146_v48  ;;  %v1271_v16 = vsel %vm1264_vm3, %v1268_v47, %v1270_v9  ;;  %v1162_v47 = vrot.slane %v1160_v35, 1  ;;  %v1023_v2 = vshrl.u32 %v1648_v20, 16 }
  0x67   : > { %v1014_v13 = vsel %vm582_vm2, %v1009_v7, %v1013_v8 }
  0x68   : > { %v1155_v18 = vsel %vm582_vm2, %v1150_v10, %v1154_v11  ;;  %v1025_v10 = vor.u32 %v1023_v2, %v1021_v40 }
  0x73   : > { %1506 = vmatmul.msk.bf16.gmra.mxu2 %vm424_vm1, %v616_v24  ;;  %1552 = vmatmul.msk.bf16.vlgmr.msra.gmra.mxu1 %vm424_vm1, %v876_v27  ;;  %v1657_v24 = vld [vmem:[%s1777_s16 + $0x24] sm:$0x10]  ;;  %v891_v27 = vshrl.u32 %v1861_v53, 16  ;;  %s1682_s16 = smul.u32 72, %s2060_s25 }
  0x74   : > { %1622 = vmatmul.msk.bf16.vlgmr.msra.gmra.mxu0 %vm424_vm1, %v1267_v15  ;;  %v1015_v15 = vshrl.u32 %v1647_v59, 16  ;;  %v1621_v32 = vor.u32 %v1657_v24, %v1620_v23  ;;  %v1163_v59 = vsel %vm582_vm2, %v1158_v46, %v1162_v47 }
  0x75   : > { %1596 = vmatmul.msk.bf16.vlgmr.msra.gmra.mxu3 %vm424_vm1, %v1139_v29  ;;  %v382_v29 = vadd.f32 %v1917_v52, %v1660_v21  ;;  %v893_v36 = vor.u32 %v891_v27, %v889_v6  ;;  %v1675_v27 = vld [vmem:[%s1909_s17 + $0x10] sm:$0xff]   ;;  %s2021_s22 = scalar_lea.vmem %s2058_s7, %s1682_s16 }
  0x76   : > { %v1017_v39 = vor.u32 %v1015_v15, %v1013_v8  ;;  %v1272_v42 = vrot.slane %v1621_v32, 1  ;;  %v384_v8 = vadd.f32 %v1917_v52, %v1664_v0 }
  0x77   : > { %v897_v48 = vsel %vm582_vm2, %v893_v36, %v896_v38 }
  0x78   : > { %v1022_v49 = vsel %vm582_vm2, %v1017_v39, %v1021_v40  ;;  %v1669_v40 = vunpack.c.h.bf16 %v1675_v27 }
  0x83   : > { %1553 = vmatmul.msk.bf16.gmra.mxu1 %vm424_vm1, %v883_v50  ;;  %1574 = vmatmul.msk.bf16.vlgmr.msra.gmra.mxu2 %vm424_vm1, %v1006_v51  ;;  %v989_v50 = vunpack.c.l.b16 %v969_v43 }
  0x84   : > { %1623 = vmatmul.msk.bf16.gmra.mxu0 %vm424_vm1, %v1269_v56 }
  0x85   : > { %1597 = vmatmul.msk.bf16.gmra.mxu3 %vm424_vm1, %v1147_v58  ;;  %v1273_v58 = vsel %vm1264_vm3, %v1270_v9, %v1272_v42  ;;  %v994_v61 = vpack.c.b16 %v989_v50, %v989_v50  ;;  %v898_v9 = vshrl.u32 %v1876_v3, 16 }
  0x87   : > { %v1027_v4 = vshll.u32 %v994_v61, 16  ;;  %v900_v17 = vor.u32 %v898_v9, %v896_v38  ;;  %v1031_v35 = vshrl.u32 %v994_v61, 16 }
  0x89   : > { %v1029_v11 = vrot.slane %v1027_v4, 1 }
  0x8b   : > { %v1030_v19 = vsel %vm582_vm2, %v1025_v10, %v1029_v11  ;;  %v1033_v41 = vor.u32 %v1031_v35, %v1029_v11 }
  0x90   : > { %v1931_v12 = vpop.f32.mrf.mxu1 }
  0x91   : > { %v453_v14 = vpop.f32.mrf.mxu0 }
  0x92   : > { %v477_v53 = vadd.f32 %v453_v14, %v382_v29  ;;  %v479_v14 = vadd.f32 %v1931_v12, %v384_v8  ;;  %v1668_v12 = vunpack.c.l.bf16 %v1675_v27 }
  0x93   : > { %1554 = vmatmul.msk.bf16.gmra.mxu1 %vm424_vm1, %v890_v45  ;;  %1575 = vmatmul.msk.bf16.gmra.mxu2 %vm424_vm1, %v1014_v13  ;;  %v1164_v13 = vshrl.u32 %v1948_v25, 16 }
  0x94   : > { %1624 = vmatmul.msk.bf16.gmra.mxu0 %vm424_vm1, %v1271_v16  ;;  %v1665_v16 = vunpack.c.h.bf16 %v1674_v60  ;;  %v386_v34 = vadd.f32 %v1917_v52, %v1668_v12 }
  0x95   : > { %1598 = vmatmul.msk.bf16.gmra.mxu3 %vm424_vm1, %v1155_v18  ;;  %v1166_v24 = vor.u32 %v1164_v13, %v1162_v47 }
  0x96   : > { %v1943_v22 = vpop.f32.mrf.mxu2  ;;  %v385_v3 = vadd.f32 %v1917_v52, %v1665_v16 }
  0x97   : > { %v481_v39 = vadd.f32 %v1943_v22, %v386_v34 }
  0x98   : > { %v1950_v26 = vpop.f32.mrf.mxu1  ;;  %v473_v30 = vpop.f32.mrf.mxu3 }
  0x99   : > { %v455_v31 = vpop.f32.mrf.mxu0  ;;  %v1955_v33 = vadd.f32 %v473_v30, %v390_v57  ;;  %v480_v28 = vadd.f32 %v1950_v26, %v385_v3 }
  0x9a   : > { %v478_v62 = vadd.f32 %v455_v31, %v383_v55 }
  0x9e   : > { %v1959_v44 = vpop.f32.mrf.mxu2 }
  0xa0   : > { %v547_v37 = vpop.f32.mrf.mxu1  ;;  %v475_v56 = vpop.f32.mrf.mxu3 }
  0xa1   : > { %v571_v51 = vadd.f32 %v547_v37, %v477_v53  ;;  %v832_v57 = vpop.f32.mrf.mxu0  ;;  %v387_v37 = vadd.f32 %v1917_v52, %v1669_v40 }
  0xa3   : > { %1555 = vmatmul.msk.bf16.gmra.mxu1 %vm424_vm1, %v897_v48  ;;  %1576 = vmatmul.msk.bf16.gmra.mxu2 %vm424_vm1, %v1022_v49  ;;  %v1676_v49 = vld [vmem:[%s1909_s17 + $0x18] sm:$0xff]  }
  0xa4   : > { %1625 = vmatmul.msk.bf16.gmra.mxu0 %vm424_vm1, %v1273_v58  ;;  %v1672_v55 = vunpack.c.l.bf16 %v1676_v49  ;;  %v1673_v2 = vunpack.c.h.bf16 %v1676_v49 }
  0xa5   : > { %1599 = vmatmul.msk.bf16.gmra.mxu3 %vm424_vm1, %v1163_v59 }
  0xa6   : > { %v1970_v63 = vpop.f32.mrf.mxu2  ;;  %v388_v61 = vadd.f32 %v1917_v52, %v1672_v55  ;;  %v389_v9 = vadd.f32 %v1917_v52, %v1673_v2 }
  0xa8   : > { %v549_v1 = vpop.f32.mrf.mxu1  ;;  %v738_v6 = vpop.f32.mrf.mxu3 }
  0xa9   : > { %v572_v5 = vadd.f32 %v549_v1, %v478_v62  ;;  %v834_v7 = vpop.f32.mrf.mxu0  ;;  %v483_v1 = vadd.f32 %v1970_v63, %v388_v61 }
  0xae   : > { %v1975_v45 = vpop.f32.mrf.mxu2 }
  0xaf   : > { %v484_v13 = vadd.f32 %v1975_v45, %v389_v9 }
  0xb0   : > { %v552_v18 = vpop.f32.mrf.mxu1  ;;  %v740_v21 = vpop.f32.mrf.mxu3 }
  0xb1   : > { %v573_v20 = vadd.f32 %v552_v18, %v479_v14  ;;  %v837_v23 = vpop.f32.mrf.mxu0 }
  0xb3   : > { %1556 = vmatmul.msk.bf16.gmra.mxu1 %vm424_vm1, %v900_v17  ;;  %1577 = vmatmul.msk.bf16.gmra.mxu2 %vm424_vm1, %v1030_v19 }
  0xb4   : > { %1626 = vmatmul.msk.bf16.gmra.mxu0 %vm424_vm1, %v1272_v42 }
  0xb5   : > { %1600 = vmatmul.msk.bf16.gmra.mxu3 %vm424_vm1, %v1166_v24 }
  0xb6   : > { %v644_v25 = vpop.f32.mrf.mxu2 }
  0xb7   : > { %v668_v15 = vadd.f32 %v644_v25, %v571_v51  ;;  %v482_v51 = vadd.f32 %v1959_v44, %v387_v37 }
  0xb8   : > { %v554_v54 = vpop.f32.mrf.mxu1  ;;  %v743_v31 = vpop.f32.mrf.mxu3 }
  0xb9   : > { %v762_v29 = vadd.f32 %v738_v6, %v668_v15  ;;  %v574_v30 = vadd.f32 %v554_v54, %v480_v28  ;;  %v839_v32 = vpop.f32.mrf.mxu0 }
  0xbb   : > { %v1988_v36 = vadd.f32 %v832_v57, %v762_v29 }
  0xbe   : > { %v646_v38 = vpop.f32.mrf.mxu2 }
  0xbf   : > { %v669_v53 = vadd.f32 %v646_v38, %v572_v5 }
  0xc0   : > { %v557_v42 = vpop.f32.mrf.mxu1  ;;  %v745_v46 = vpop.f32.mrf.mxu3 }
  0xc1   : > { %v763_v26 = vadd.f32 %v740_v21, %v669_v53  ;;  %v575_v43 = vadd.f32 %v557_v42, %v481_v39  ;;  %v842_v47 = vpop.f32.mrf.mxu0 }
  0xc3   : > { %1578 = vmatmul.msk.bf16.gmra.mxu2 %vm424_vm1, %v1033_v41  ;;  %v1993_v48 = vadd.f32 %v834_v7, %v763_v26 }
  0xc6   : > { %v649_v50 = vpop.f32.mrf.mxu2 }
  0xc7   : > { %v670_v22 = vadd.f32 %v649_v50, %v573_v20 }
  0xc8   : > { %v559_v56 = vpop.f32.mrf.mxu1  ;;  %v748_v59 = vpop.f32.mrf.mxu3 }
  0xc9   : > { %v764_v57 = vadd.f32 %v743_v31, %v670_v22  ;;  %v576_v58 = vadd.f32 %v559_v56, %v482_v51  ;;  %v844_v60 = vpop.f32.mrf.mxu0 }
  0xcb   : > { %v1998_v62 = vadd.f32 %v837_v23, %v764_v57 }
  0xce   : > { %v651_v0 = vpop.f32.mrf.mxu2 }
  0xcf   : > { %v671_v4 = vadd.f32 %v651_v0, %v574_v30 }
  0xd0   : > { %v562_v5 = vpop.f32.mrf.mxu1  ;;  %v750_v44 = vpop.f32.mrf.mxu3 }
  0xd1   : > { %v765_v6 = vadd.f32 %v745_v46, %v671_v4  ;;  %v577_v7 = vadd.f32 %v562_v5, %v483_v1  ;;  %v847_v8 = vpop.f32.mrf.mxu0 }
  0xd3   : > { %v2002_v10 = vadd.f32 %v839_v32, %v765_v6 }
  0xd6   : > { %v654_v11 = vpop.f32.mrf.mxu2 }
  0xd7   : > { %v672_v14 = vadd.f32 %v654_v11, %v575_v43 }
  0xd8   : > { %v564_v16 = vpop.f32.mrf.mxu1  ;;  %v753_v19 = vpop.f32.mrf.mxu3 }
  0xd9   : > { %v766_v17 = vadd.f32 %v748_v59, %v672_v14  ;;  %v578_v18 = vadd.f32 %v564_v16, %v484_v13  ;;  %v849_v63 = vpop.f32.mrf.mxu0 }
  0xdb   : > { %v2005_v20 = vadd.f32 %v842_v47, %v766_v17 }
  0xde   : > { %v656_v21 = vpop.f32.mrf.mxu2 }
  0xdf   : > { %v673_v23 = vadd.f32 %v656_v21, %v576_v58 }
  0xe0   : > { %v567_v24 = vpop.f32.mrf.mxu1  ;;  %v755_v52 = vpop.f32.mrf.mxu3 }
  0xe1   : > { %v767_v3 = vadd.f32 %v750_v44, %v673_v23  ;;  %v579_v27 = vadd.f32 %v567_v24, %v1955_v33  ;;  %v852_v25 = vpop.f32.mrf.mxu0 }
  0xe3   : > { %v2008_v12 = vadd.f32 %v844_v60, %v767_v3 }
  0xe6   : > { %v659_v28 = vpop.f32.mrf.mxu2 }
  0xe7   : > { %v674_v45 = vadd.f32 %v659_v28, %v577_v7 }
  0xe8   : > { %v569_v15 = vpop.f32.mrf.mxu1  ;;  %v758_v29 = vpop.f32.mrf.mxu3 }
  0xe9   : > { %v768_v54 = vadd.f32 %v753_v19, %v674_v45  ;;  %v854_v30 = vpop.f32.mrf.mxu0 }
  0xeb   : > { %v2010_v31 = vadd.f32 %v847_v8, %v768_v54 }
  0xee   : > { %v661_v32 = vpop.f32.mrf.mxu2 }
  0xef   : > { %v675_v34 = vadd.f32 %v661_v32, %v578_v18 }
  0xf0   : > { %v928_v35 = vpop.f32.mrf.mxu1  ;;  %v760_v39 = vpop.f32.mrf.mxu3 }
  0xf1   : > { %v769_v38 = vadd.f32 %v755_v52, %v675_v34  ;;  %v1301_v40 = vpop.f32.mrf.mxu0  ;;  %v952_v55 = vadd.f32 %v928_v35, %v1988_v36 }
  0xf3   : > { %v2012_v33 = vadd.f32 %v849_v63, %v769_v38 }
  0xf6   : > { %v664_v53 = vpop.f32.mrf.mxu2 }
  0xf7   : > { %v676_v41 = vadd.f32 %v664_v53, %v579_v27 }
  0xf8   : > { %v930_v42 = vpop.f32.mrf.mxu1  ;;  %v1194_v43 = vpop.f32.mrf.mxu3 }
  0xf9   : > { %v770_v26 = vadd.f32 %v758_v29, %v676_v41  ;;  %v1303_v46 = vpop.f32.mrf.mxu0  ;;  %v953_v0 = vadd.f32 %v930_v42, %v1993_v48 }
  0xfb   : > { %v2014_v47 = vadd.f32 %v852_v25, %v770_v26 }
  0xfe   : > { %v666_v37 = vpop.f32.mrf.mxu2 }
 0x100   : > { %v933_v49 = vpop.f32.mrf.mxu1  ;;  %v1196_v50 = vpop.f32.mrf.mxu3 }
 0x101   : > { %v1306_v51 = vpop.f32.mrf.mxu0  ;;  %v954_v44 = vadd.f32 %v933_v49, %v1998_v62 }
 0x106   : > { %v1061_v22 = vpop.f32.mrf.mxu2 }
 0x107   : > { %v1085_v56 = vadd.f32 %v1061_v22, %v952_v55 }
 0x108   : > { %v935_v57 = vpop.f32.mrf.mxu1  ;;  %v1199_v59 = vpop.f32.mrf.mxu3 }
 0x109   : > { %v1218_v58 = vadd.f32 %v1194_v43, %v1085_v56  ;;  %v1308_v60 = vpop.f32.mrf.mxu0  ;;  %v955_v17 = vadd.f32 %v935_v57, %v2002_v10 }
 0x10b   : > { %v1325_v61 = vadd.f32 %v1301_v40, %v1218_v58 }
 0x10d   : > { %1334 = vst.msk [vmem:[%s2021_s22] sm:$0xff] %vm424_vm1, %v1325_v61 }
 0x10e   : > { %v1063_v36 = vpop.f32.mrf.mxu2 }
 0x10f   : > { %v1086_v1 = vadd.f32 %v1063_v36, %v953_v0 }
 0x110   : > { %v938_v2 = vpop.f32.mrf.mxu1  ;;  %v1201_v5 = vpop.f32.mrf.mxu3 }
 0x111   : > { %v1219_v4 = vadd.f32 %v1196_v50, %v1086_v1  ;;  %v1311_v6 = vpop.f32.mrf.mxu0  ;;  %v956_v3 = vadd.f32 %v938_v2, %v2005_v20 }
 0x113   : > { %v1326_v7 = vadd.f32 %v1303_v46, %v1219_v4 }
 0x115   : > { %1335 = vst.msk [vmem:[%s2021_s22 + $0x8] sm:$0xff] %vm424_vm1, %v1326_v7 }
 0x116   : > { %v1066_v8 = vpop.f32.mrf.mxu2 }
 0x117   : > { %v1087_v9 = vadd.f32 %v1066_v8, %v954_v44 }
 0x118   : > { %v940_v11 = vpop.f32.mrf.mxu1  ;;  %v1204_v48 = vpop.f32.mrf.mxu3 }
 0x119   : > { %v1220_v13 = vadd.f32 %v1199_v59, %v1087_v9  ;;  %v1313_v14 = vpop.f32.mrf.mxu0  ;;  %v957_v54 = vadd.f32 %v940_v11, %v2008_v12 }
 0x11b   : > { %v1327_v16 = vadd.f32 %v1306_v51, %v1220_v13 }
 0x11d   : > { %1336 = vst.msk [vmem:[%s2021_s22 + $0x10] sm:$0xff] %vm424_vm1, %v1327_v16 }
 0x11e   : > { %v1068_v18 = vpop.f32.mrf.mxu2 }
 0x11f   : > { %v1088_v19 = vadd.f32 %v1068_v18, %v955_v17 }
 0x120   : > { %v943_v63 = vpop.f32.mrf.mxu1  ;;  %v1206_v62 = vpop.f32.mrf.mxu3 }
 0x121   : > { %v1221_v21 = vadd.f32 %v1201_v5, %v1088_v19  ;;  %v1316_v23 = vpop.f32.mrf.mxu0  ;;  %v958_v39 = vadd.f32 %v943_v63, %v2010_v31 }
 0x123   : > { %v1328_v24 = vadd.f32 %v1308_v60, %v1221_v21 }
 0x125   : > { %1337 = vst.msk [vmem:[%s2021_s22 + $0x18] sm:$0xff] %vm424_vm1, %v1328_v24 }
 0x126   : > { %v1071_v27 = vpop.f32.mrf.mxu2 }
 0x127   : > { %v1089_v52 = vadd.f32 %v1071_v27, %v956_v3 }
 0x128   : > { %v945_v25 = vpop.f32.mrf.mxu1  ;;  %v1209_v10 = vpop.f32.mrf.mxu3 }
 0x129   : > { %v1222_v28 = vadd.f32 %v1204_v48, %v1089_v52  ;;  %v1318_v45 = vpop.f32.mrf.mxu0  ;;  %v959_v46 = vadd.f32 %v945_v25, %v2012_v33 }
 0x12b   : > { %v1329_v15 = vadd.f32 %v1311_v6, %v1222_v28 }
 0x12d   : > { %1338 = vst.msk [vmem:[%s2021_s22 + $0x20] sm:$0xff] %vm424_vm1, %v1329_v15 }
 0x12e   : > { %v1073_v29 = vpop.f32.mrf.mxu2 }
 0x12f   : > { %v1090_v30 = vadd.f32 %v1073_v29, %v957_v54 }
 0x130   : > { %v948_v32 = vpop.f32.mrf.mxu1  ;;  %v1211_v20 = vpop.f32.mrf.mxu3 }
 0x131   : > { %v1223_v34 = vadd.f32 %v1206_v62, %v1090_v30  ;;  %v1321_v35 = vpop.f32.mrf.mxu0  ;;  %v960_v55 = vadd.f32 %v948_v32, %v2014_v47 }
 0x133   : > { %v1330_v38 = vadd.f32 %v1313_v14, %v1223_v34 }
 0x135   : > { %1339 = vst.msk [vmem:[%s2021_s22 + $0x28] sm:$0xff] %vm424_vm1, %v1330_v38 }
 0x136   : > { %v1076_v40 = vpop.f32.mrf.mxu2 }
 0x137   : > { %v1091_v53 = vadd.f32 %v1076_v40, %v958_v39 }
 0x138   : > { %v950_v41 = vpop.f32.mrf.mxu1  ;;  %v1214_v12 = vpop.f32.mrf.mxu3 }
 0x139   : > { %v1224_v42 = vadd.f32 %v1209_v10, %v1091_v53  ;;  %v1323_v26 = vpop.f32.mrf.mxu0 }
 0x13b   : > { %v1331_v43 = vadd.f32 %v1316_v23, %v1224_v42 }
 0x13d   : > { %1340 = vst.msk [vmem:[%s2021_s22 + $0x30] sm:$0xff] %vm424_vm1, %v1331_v43 }
 0x13e   : > { %v1078_v37 = vpop.f32.mrf.mxu2 }
 0x13f   : > { %v1092_v49 = vadd.f32 %v1078_v37, %v959_v46 }
 0x140   : > { %v1216_v51 = vpop.f32.mrf.mxu3 }
 0x141   : > { %v1225_v50 = vadd.f32 %v1211_v20, %v1092_v49 }
 0x143   : > { %v1332_v31 = vadd.f32 %v1318_v45, %v1225_v50 }
 0x145   : > { %1341 = vst.msk [vmem:[%s2021_s22 + $0x38] sm:$0xff] %vm424_vm1, %v1332_v31 }
 0x146   : > { %v1081_v22 = vpop.f32.mrf.mxu2 }
 0x147   : > { %v1093_v56 = vadd.f32 %v1081_v22, %v960_v55 }
 0x149   : > { %v1226_v57 = vadd.f32 %v1214_v12, %v1093_v56 }
 0x14b   : > { %v1333_v58 = vadd.f32 %v1321_v35, %v1226_v57 }
 0x14d   : > { %1343 = vst.msk [vmem:[%s2021_s22 + $0x40] sm:$0x7f] %vm1342_vm4, %v1333_v58 }
 0x14e   : > { %v1083_v59 = vpop.f32.mrf.mxu2 }
 0x14f PF: > { %s17_s24 = sadd.s32 1, %s1698_s24  }
 0x150   : > { %p14_p4 = scmp.ge.s32.totalorder %s17_s24, 4  }
 0x152   :  { %16 = sbr.rel (!%p14_p4) target bundleno = 1 (0x1), region = 98 }

// kernel: pan_forward.5
= control target key start
LH: loop header
LB: loop body
LE: loop exit
PB: predicated region body
PF: predicated region fallthrough
CT: control target
= control target key end

     0   :  { %s1054_s24 = smov 0   ;;  %s1185_s0 = inlined_call_operand.vmem [shape: bf16[2,25,8], index: 0, kind: input, shape index: {}]   ;;  %s1186_s1 = inlined_call_operand.vmem [shape: bf16[2,25,8], index: 1, kind: input, shape index: {}]   ;;  %s1187_s2 = inlined_call_operand.vmem [shape: bf16[2,25,8], index: 2, kind: input, shape index: {}]   ;;  %s1188_s3 = inlined_call_operand.vmem [shape: bf16[2,25,8], index: 3, kind: input, shape index: {}]   ;;  %s1189_s4 = inlined_call_operand.vmem [shape: bf16[9,8,8], index: 4, kind: input, shape index: {}]   ;;  %s1190_s5 = inlined_call_operand.vmem [shape: f32[1,8], index: 5, kind: input, shape index: {}]   ;;  %s1191_s6 = inlined_call_operand.vmem [shape: bf16[2,19,8], index: 6, kind: input, shape index: {}]   ;;  %s1192_s7 = inlined_call_operand.vmem [shape: f32[2,19,8], index: 7, kind: output, shape index: {}]  }
   0x1 LB: > { %s909_s25 = sadd.s32 4294967295, %s1012_s24   ;;  %p913_p0 = scmp.ge.s32.totalorder %s1012_s24, 1  ;;  %s1012_s24 = sphi %s1054_s24, %s17_s24  }
   0x2   : > { %p277_p1 = scmp.lt.s32.totalorder %s1012_s24, 3 }
   0x4   : > { %p278_p2 = pnand %p913_p0, %p277_p1 }
   0x5   : > { %p329_p3 = scmp.lt.s32.totalorder (!%p278_p2), %s909_s25, 1 }
   0x6   : > { %281 = sbr.rel (%p278_p2) target bundleno = 220 (0xdc), region = 48 }
   0xb   : > { %v376_v0 = vld [vmem:[%s1189_s4] sm:$0xf]  ;;  %vm392_vm0 = vcmask 1043456   ;;  %v926_v2 = vld [vmem:[%s1189_s4 + $0x4] sm:$0xf]  ;;  %s1194_s25 = smov (!%p329_p3, %s909_s25), 1 }
   0xc   : > { %v394_v1 = vsel %vm392_vm0, %v376_v0, 0  ;;  %v932_v3 = vld [vmem:[%s1189_s4 + $0xc] sm:$0xf]  ;;  %v437_v4 = vsel %vm392_vm0, %v926_v2, 0  ;;  %v939_v6 = vld [vmem:[%s1189_s4 + $0x10] sm:$0xf] }
   0xd   : > { %403 = vmatpush.bf16.msra.mxu0 %v394_v1  ;;  %994 = vmatpush.bf16.msra.mxu1 %v394_v1  ;;  %v526_v5 = vsel %vm392_vm0, %v932_v3, 0  ;;  %vm385_vm1 = vcmask 64512   ;;  %v569_v7 = vsel %vm392_vm0, %v939_v6, 0  ;;  %v929_v8 = vld [vmem:[%s1189_s4 + $0x8] sm:$0xf]  ;;  %s1084_s13 = sshll.u32 %s1194_s25, 4 }
   0xe   : > { %535 = vmatpush.bf16.msra.mxu3 %v526_v5  ;;  %v483_v9 = vsel %vm392_vm0, %v929_v8, 0  ;;  %v949_v10 = vld [vmem:[%s1189_s4 + $0x18] sm:$0xf]  ;;  %v952_v11 = vld [vmem:[%s1189_s4 + $0x1c] sm:$0xf]  ;;  %s1097_s20 = scalar_lea.vmem %s1185_s0, %s1084_s13  ;;  %s343_s23 = scalar_lea.vmem %s1187_s2, %s1084_s13  ;;  %vm768_vm4 = vcmask 1044480  }
   0xf   : > { %492 = vmatpush.bf16.msra.mxu2 %v483_v9  ;;  %v672_v12 = vsel %vm392_vm0, %v949_v10, 0  ;;  %v729_v13 = vsel %vm392_vm0, %v952_v11, 0  ;;  %v946_v14 = vld [vmem:[%s1189_s4 + $0x14] sm:$0xf]  ;;  %v955_v15 = vld [vmem:[%s1189_s4 + $0x20] sm:$0xf]  ;;  %s1125_s9 = scalar_lea.vmem %s1186_s1, %s1084_s13  ;;  %s348_s12 = scalar_lea.vmem %s1188_s3, %s1084_s13 }
  0x10   : > { %v981_v16 = vld [vmem:[%s1097_s20] sm:$0xff]   ;;  %v375_v17 = vld [vmem:[%s1097_s20 + $0x8] sm:$0x3]  ;;  %v779_v19 = vsel %vm392_vm0, %v955_v15, 0  ;;  %v614_v25 = vsel %vm392_vm0, %v946_v14, 0  ;;  %s995_s13 = smul.u32 12, %s1194_s25 }
  0x11   : > { %446 = vmatpush.bf16.msrb.mxu1 %v437_v4  ;;  %578 = vmatpush.bf16.msrb.mxu0 %v569_v7  ;;  %v1113_v18 = vld [vmem:[%s343_s23] sm:$0xff]  ;;  %v463_v20 = vshrl.u32 %v981_v16, 16  ;;  %v465_v21 = vshll.u32 %v981_v16, 16  ;;  %v382_v22 = vunpack.c.l.b16 %v375_v17  ;;  %vm462_vm2 = vsmask.f32 7424  ;;  %s996_s19 = smul.u32 24, %s1194_s25 }
  0x12   : > { %738 = vmatpush.bf16.msrb.mxu3 %v729_v13  ;;  %924 = vmatmul.msk.bf16.vlgmr.msra.gmra.mxu0 %vm385_vm1, %v981_v16  ;;  %v508_v29 = vld [vmem:[%s343_s23 + $0x8] sm:$0x3]  ;;  %v991_v33 = vld [vmem:[%s1125_s9] sm:$0xf0]  ;;  %v992_v34 = vld [vmem:[%s1125_s9] sm:$0xc]  ;;  %s353_s16 = scalar_lea.vmem %s1191_s6, %s995_s13 }
  0x13   : > { %681 = vmatpush.bf16.msrb.mxu2 %v672_v12  ;;  %937 = vmatmul.msk.bf16.vlgmr.msra.gmra.mxu3 %vm385_vm1, %v1113_v18  ;;  %v467_v23 = vrot.slane %v465_v21, 1  ;;  %v384_v24 = vpack.c.b16 %v382_v22, %v382_v22  ;;  %v696_v30 = vld [vmem:[%s1125_s9 + $0x8] sm:$0xf]  ;;  %v516_v32 = vunpack.c.l.b16 %v508_v29  ;;  %v973_v36 = vld [vmem:[%s348_s12] sm:$0xff]  ;;  %v993_v38 = vor.u32 %v992_v34, %v991_v33  ;;  %v975_v15 = vld [vmem:[%s1097_s20 + $0x8] sm:$0x10]  ;;  %s358_s22 = scalar_lea.vmem %s1192_s7, %s996_s19 }
  0x14   : > { %v702_v35 = vunpack.c.l.b16 %v696_v30  ;;  %v638_v40 = vld [vmem:[%s1097_s20 + $0x8] sm:$0xf]  ;;  %v985_v41 = vld [vmem:[%s1125_s9] sm:$0xff]   ;;  %vm647_vm3 = vsmask.f32 5376  ;;  %v596_v16 = vshll.u32 %v1113_v18, 16 }
  0x15   : > { %788 = vmatpush.bf16.msra.mxu0 %v779_v19  ;;  %v468_v26 = vor.u32 %v467_v23, %v463_v20  ;;  %925 = vmatmul.msk.bf16.vlgmr.msra.gmra.mxu1 %vm385_vm1, %v384_v24  ;;  %v469_v27 = vshll.u32 %v384_v24, 16  ;;  %v1136_v37 = vpack.c.b16 %v516_v32, %v516_v32  ;;  %v473_v42 = vshrl.u32 %v384_v24, 16  ;;  %v988_v47 = vld [vmem:[%s1097_s20] sm:$0xf0]  ;;  %v989_v48 = vld [vmem:[%s1097_s20] sm:$0xc] }
  0x16   : > { %623 = vmatpush.bf16.msra.mxu1 %v614_v25  ;;  %v704_v39 = vpack.c.b16 %v702_v35, %v702_v35  ;;  %v706_v43 = vshrl.u32 %v993_v38, 16  ;;  %v709_v44 = vshll.u32 %v993_v38, 16  ;;  %v644_v49 = vunpack.c.l.b16 %v638_v40  ;;  %v551_v51 = vld [vmem:[%s348_s12 + $0x8] sm:$0x3]  ;;  %v958_v10 = vld [vmem:[%s1097_s20] sm:$0x8] }
  0x17   : > { %v471_v28 = vrot.slane %v469_v27, 1  ;;  %v990_v54 = vor.u32 %v989_v48, %v988_v47  ;;  %v559_v58 = vunpack.c.l.b16 %v551_v51  ;;  %v419_v59 = vld [vmem:[%s1125_s9 + $0x8] sm:$0x3]  ;;  %v974_v13 = vld [vmem:[%s1097_s20] sm:$0xf0]  ;;  %v594_v21 = vshrl.u32 %v1113_v18, 16 }
  0x18   : > { %v714_v45 = vshrl.u32 %v704_v39, 16  ;;  %v717_v46 = vshll.u32 %v704_v39, 16  ;;  %v708_v52 = vrot.slane %v706_v43, 2  ;;  %v711_v53 = vrot.slane %v709_v44, 3  ;;  %v962_v14 = vld [vmem:[%s1097_s20 + $0x8] sm:$0xf] }
  0x19   : > { %v472_v31 = vsel %vm462_vm2, %v468_v26, %v471_v28  ;;  %v475_v50 = vor.u32 %v473_v42, %v471_v28  ;;  %v646_v57 = vpack.c.b16 %v644_v49, %v644_v49  ;;  %v649_v61 = vshrl.u32 %v990_v54, 16  ;;  %v977_v43 = vld [vmem:[%s353_s16] sm:$0xff]  }
  0x1a   : > { %930 = vmatmul.msk.bf16.vlgmr.msra.gmra.mxu2 %vm385_vm1, %v472_v31  ;;  %v716_v55 = vrot.slane %v714_v45, 2  ;;  %v719_v56 = vrot.slane %v717_v46, 3  ;;  %v712_v60 = vor.u32 %v711_v53, %v708_v52  ;;  %v652_v63 = vshll.u32 %v990_v54, 16  ;;  %v1005_v46 = vld [vmem:[%s1190_s5] ss:$0 sm:$0xff] }
  0x1b   : > { %v657_v0 = vshrl.u32 %v646_v57, 16  ;;  %v660_v1 = vshll.u32 %v646_v57, 16  ;;  %v561_v2 = vpack.c.b16 %v559_v58, %v559_v58  ;;  %v427_v3 = vunpack.c.l.b16 %v419_v59  ;;  %v362_v59 = vld [vmem:[%s353_s16 + $0x8] sm:$0x3] }
  0x1c   : > { %v720_v62 = vor.u32 %v719_v56, %v716_v55  ;;  %v651_v4 = vrot.slane %v649_v61, 2  ;;  %v654_v6 = vrot.slane %v652_v63, 3  ;;  %v959_v17 = vor.u32 %v974_v13, %v958_v10 }
  0x1d   : > { %v659_v7 = vrot.slane %v657_v0, 2  ;;  %v662_v8 = vrot.slane %v660_v1, 3  ;;  %v429_v9 = vpack.c.b16 %v427_v3, %v427_v3  ;;  %v963_v19 = vor.u32 %v975_v15, %v962_v14 }
  0x1e   : > { %v721_v5 = vsel %vm647_vm3, %v712_v60, %v720_v62  ;;  %v655_v11 = vor.u32 %v654_v6, %v651_v4  ;;  %v598_v22 = vrot.slane %v596_v16, 1  ;;  %v600_v23 = vshll.u32 %v1136_v37, 16 }
  0x1f   : > { %v663_v12 = vor.u32 %v662_v8, %v659_v7  ;;  %v769_v24 = vrot.slane %v959_v17, 3  ;;  %v770_v25 = vrot.slane %v963_v19, 3  ;;  %v604_v18 = vshrl.u32 %v1136_v37, 16 }
  0x20   : > { %v602_v26 = vrot.slane %v600_v23, 1  ;;  %v599_v28 = vor.u32 %v598_v22, %v594_v21  ;;  %v978_v45 = vunpack.c.l.bf16 %v977_v43  ;;  %v979_v53 = vunpack.c.h.bf16 %v977_v43 }
  0x21   : > { %v664_v20 = vsel %vm647_vm3, %v655_v11, %v663_v12  ;;  %v771_v27 = vsel %vm768_vm4, %v769_v24, %v770_v25  ;;  %vm804_vm5 = vcmask 59392  }
  0x22   : > { %944 = vmatmul.msk.bf16.vlgmr.msrb.gmra.mxu0 %vm385_vm1, %v973_v36  ;;  %v603_v29 = vsel %vm462_vm2, %v599_v28, %v602_v26  ;;  %v606_v30 = vor.u32 %v604_v18, %v602_v26  ;;  %v371_v58 = vadd.f32 %v1005_v46, %v979_v53 }
  0x23   : > { %938 = vmatmul.msk.bf16.gmra.mxu3 %vm385_vm1, %v1136_v37 }
  0x25   : > { %927 = vmatmul.msk.bf16.vlgmr.msrb.gmra.mxu1 %vm385_vm1, %v985_v41 }
  0x2a   : > { %931 = vmatmul.msk.bf16.gmra.mxu2 %vm385_vm1, %v475_v50  ;;  %v370_v50 = vadd.f32 %v1005_v46, %v978_v45 }
  0x32   : > { %945 = vmatmul.msk.bf16.gmra.mxu0 %vm385_vm1, %v561_v2 }
  0x33   : > { %953 = vmatmul.msk.bf16.vlgmr.msrb.gmra.mxu3 %vm385_vm1, %v721_v5 }
  0x35   : > { %928 = vmatmul.msk.bf16.gmra.mxu1 %vm385_vm1, %v429_v9 }
  0x3a   : > { %950 = vmatmul.msk.bf16.vlgmr.msrb.gmra.mxu2 %vm385_vm1, %v664_v20 }
  0x42   : > { %964 = vmatmul.msk.bf16.vlgmr.msra.gmra.mxu0 %vm385_vm1, %v771_v27 }
  0x43   : > { %954 = vmatmul.msk.bf16.gmra.mxu3 %vm385_vm1, %v720_v62  ;;  %v365_v62 = vunpack.c.l.bf16 %v362_v59 }
  0x45   : > { %947 = vmatmul.msk.bf16.vlgmr.msra.gmra.mxu1 %vm385_vm1, %v603_v29  ;;  %v372_v5 = vadd.f32 %v1005_v46, %v365_v62 }
  0x4a   : > { %951 = vmatmul.msk.bf16.gmra.mxu2 %vm385_vm1, %v663_v12 }
  0x52   : > { %965 = vmatmul.msk.bf16.gmra.mxu0 %vm385_vm1, %v770_v25 }
  0x55   : > { %948 = vmatmul.msk.bf16.gmra.mxu1 %vm385_vm1, %v606_v30 }
  0x8f   : > { %v405_v31 = vpop.f32.mrf.mxu0 }
  0x90   : > { %v414_v52 = vadd.f32 %v405_v31, %v370_v50 }
  0x92   : > { %v410_v32 = vpop.f32.mrf.mxu1 }
  0x93   : > { %v416_v9 = vadd.f32 %v410_v32, %v372_v5 }
  0x96   : > { %v537_v33 = vpop.f32.mrf.mxu3 }
  0x97   : > { %v407_v34 = vpop.f32.mrf.mxu0 }
  0x98   : > { %v415_v63 = vadd.f32 %v407_v34, %v371_v58 }
  0x9a   : > { %v412_v35 = vpop.f32.mrf.mxu1 }
  0x9d   : > { %v494_v36 = vpop.f32.mrf.mxu2 }
  0x9e   : > { %v539_v38 = vpop.f32.mrf.mxu3 }
  0x9f   : > { %v580_v39 = vpop.f32.mrf.mxu0 }
  0xa2   : > { %v448_v40 = vpop.f32.mrf.mxu1 }
  0xa3   : > { %v457_v54 = vadd.f32 %v448_v40, %v414_v52 }
  0xa5   : > { %v496_v37 = vpop.f32.mrf.mxu2  ;;  %v503_v60 = vadd.f32 %v494_v36, %v457_v54 }
  0xa6   : > { %v542_v41 = vpop.f32.mrf.mxu3 }
  0xa7   : > { %v582_v42 = vpop.f32.mrf.mxu0  ;;  %v546_v2 = vadd.f32 %v537_v33, %v503_v60 }
  0xa9   : > { %v589_v7 = vadd.f32 %v580_v39, %v546_v2 }
  0xaa   : > { %v450_v44 = vpop.f32.mrf.mxu1 }
  0xab   : > { %v458_v0 = vadd.f32 %v450_v44, %v415_v63 }
  0xad   : > { %v499_v47 = vpop.f32.mrf.mxu2  ;;  %v504_v6 = vadd.f32 %v496_v37, %v458_v0 }
  0xae   : > { %v544_v48 = vpop.f32.mrf.mxu3 }
  0xaf   : > { %v585_v49 = vpop.f32.mrf.mxu0  ;;  %v547_v14 = vadd.f32 %v539_v38, %v504_v6 }
  0xb1   : > { %v590_v21 = vadd.f32 %v582_v42, %v547_v14 }
  0xb2   : > { %v453_v51 = vpop.f32.mrf.mxu1 }
  0xb3   : > { %v459_v11 = vadd.f32 %v453_v51, %v416_v9 }
  0xb5   : > { %v501_v55 = vpop.f32.mrf.mxu2  ;;  %v505_v19 = vadd.f32 %v499_v47, %v459_v11 }
  0xb6   : > { %v740_v56 = vpop.f32.mrf.mxu3 }
  0xb7   : > { %v587_v57 = vpop.f32.mrf.mxu0  ;;  %v548_v26 = vadd.f32 %v542_v41, %v505_v19 }
  0xb9   : > { %v591_v30 = vadd.f32 %v585_v49, %v548_v26 }
  0xba   : > { %v455_v61 = vpop.f32.mrf.mxu1 }
  0xbd   : > { %v683_v1 = vpop.f32.mrf.mxu2 }
  0xbe   : > { %v742_v3 = vpop.f32.mrf.mxu3 }
  0xbf   : > { %v790_v4 = vpop.f32.mrf.mxu0 }
  0xc2   : > { %v625_v8 = vpop.f32.mrf.mxu1 }
  0xc3   : > { %v634_v10 = vadd.f32 %v625_v8, %v589_v7 }
  0xc5   : > { %v692_v12 = vadd.f32 %v683_v1, %v634_v10  ;;  %v685_v13 = vpop.f32.mrf.mxu2 }
  0xc6   : > { %v745_v15 = vpop.f32.mrf.mxu3 }
  0xc7   : > { %v792_v16 = vpop.f32.mrf.mxu0  ;;  %v749_v17 = vadd.f32 %v740_v56, %v692_v12 }
  0xc9   : > { %v799_v20 = vadd.f32 %v790_v4, %v749_v17 }
  0xca   : > { %v627_v22 = vpop.f32.mrf.mxu1 }
  0xcb   : > { %802 = vst.msk [vmem:[%s358_s22] sm:$0xff] %vm385_vm1, %v799_v20  ;;  %v635_v23 = vadd.f32 %v627_v22, %v590_v21 }
  0xcd   : > { %v693_v24 = vadd.f32 %v685_v13, %v635_v23  ;;  %v688_v25 = vpop.f32.mrf.mxu2 }
  0xce   : > { %v747_v27 = vpop.f32.mrf.mxu3 }
  0xcf   : > { %v795_v28 = vpop.f32.mrf.mxu0  ;;  %v750_v29 = vadd.f32 %v742_v3, %v693_v24 }
  0xd1   : > { %v800_v18 = vadd.f32 %v792_v16, %v750_v29 }
  0xd2   : > { %v630_v31 = vpop.f32.mrf.mxu1 }
  0xd3   : > { %803 = vst.msk [vmem:[%s358_s22 + $0x8] sm:$0xff] %vm385_vm1, %v800_v18  ;;  %v636_v32 = vadd.f32 %v630_v31, %v591_v30 }
  0xd5   : > { %v694_v33 = vadd.f32 %v688_v25, %v636_v32  ;;  %v690_v34 = vpop.f32.mrf.mxu2 }
  0xd7   : > { %v797_v35 = vpop.f32.mrf.mxu0  ;;  %v751_v36 = vadd.f32 %v745_v15, %v694_v33 }
  0xd9   : > { %v801_v38 = vadd.f32 %v795_v28, %v751_v36 }
  0xda   : > { %v632_v39 = vpop.f32.mrf.mxu1 }
  0xdb   : > { %805 = vst.msk [vmem:[%s358_s22 + $0x10] sm:$0x7] %vm804_vm5, %v801_v38 }
  0xdc PF: > { %s17_s24 = sadd.s32 1, %s1012_s24  }
  0xdd   : > { %p14_p4 = scmp.ge.s32.totalorder %s17_s24, 4  }
  0xdf   :  { %16 = sbr.rel (!%p14_p4) target bundleno = 1 (0x1), region = 98 }

// kernel: pan_forward.6
= control target key start
LH: loop header
LB: loop body
LE: loop exit
PB: predicated region body
PF: predicated region fallthrough
CT: control target
= control target key end

     0   :  { %s820_s24 = smov 0   ;;  %s914_s0 = inlined_call_operand.vmem [shape: bf16[2,9,8], index: 0, kind: input, shape index: {}]   ;;  %s915_s1 = inlined_call_operand.vmem [shape: bf16[2,9,8], index: 1, kind: input, shape index: {}]   ;;  %s916_s2 = inlined_call_operand.vmem [shape: bf16[2,9,8], index: 2, kind: input, shape index: {}]   ;;  %s917_s3 = inlined_call_operand.vmem [shape: bf16[2,9,8], index: 3, kind: input, shape index: {}]   ;;  %s918_s4 = inlined_call_operand.vmem [shape: bf16[9,8,8], index: 4, kind: input, shape index: {}]   ;;  %s919_s5 = inlined_call_operand.vmem [shape: f32[1,8], index: 5, kind: input, shape index: {}]   ;;  %s920_s6 = inlined_call_operand.vmem [shape: bf16[2,5,8], index: 6, kind: input, shape index: {}]   ;;  %s921_s7 = inlined_call_operand.vmem [shape: f32[2,5,8], index: 7, kind: output, shape index: {}]  }
   0x1 LB: > { %s720_s25 = sadd.s32 4294967295, %s778_s24   ;;  %p724_p0 = scmp.ge.s32.totalorder %s778_s24, 1  ;;  %s778_s24 = sphi %s820_s24, %s17_s24  }
   0x2   : > { %p276_p1 = scmp.lt.s32.totalorder %s778_s24, 3 }
   0x4   : > { %p277_p2 = pnand %p724_p0, %p276_p1 }
   0x5   : > { %p326_p3 = scmp.lt.s32.totalorder (!%p277_p2), %s720_s25, 1 }
   0x6   : > { %280 = sbr.rel (%p277_p2) target bundleno = 184 (0xb8), region = 48 }
   0xb   : > { %v363_v0 = vld [vmem:[%s918_s4] sm:$0xf]  ;;  %vm368_vm0 = vcmask 1043456   ;;  %v736_v1 = vld [vmem:[%s918_s4 + $0x4] sm:$0xf]  ;;  %s923_s25 = smov (!%p326_p3, %s720_s25), 1 }
   0xc   : > { %v370_v2 = vsel %vm368_vm0, %v363_v0, 0  ;;  %v393_v3 = vsel %vm368_vm0, %v736_v1, 0  ;;  %v740_v4 = vld [vmem:[%s918_s4 + $0xc] sm:$0xf]  ;;  %v742_v6 = vld [vmem:[%s918_s4 + $0x10] sm:$0xf] }
   0xd   : > { %379 = vmatpush.bf16.msra.mxu0 %v370_v2  ;;  %402 = vmatpush.bf16.msra.mxu1 %v393_v3  ;;  %v448_v5 = vsel %vm368_vm0, %v740_v4, 0  ;;  %v738_v7 = vld [vmem:[%s918_s4 + $0x8] sm:$0xf]  ;;  %v471_v8 = vsel %vm368_vm0, %v742_v6, 0  ;;  %v746_v10 = vld [vmem:[%s918_s4 + $0x18] sm:$0xf] }
   0xe   : > { %457 = vmatpush.bf16.msra.mxu3 %v448_v5  ;;  %v425_v9 = vsel %vm368_vm0, %v738_v7, 0  ;;  %v748_v11 = vld [vmem:[%s918_s4 + $0x1c] sm:$0xf]  ;;  %s857_s17 = sshll.u32 %s923_s25, 3  ;;  %vm364_vm1 = vcmask 64512   ;;  %v537_v12 = vsel %vm368_vm0, %v746_v10, 0 }
   0xf   : > { %434 = vmatpush.bf16.msra.mxu2 %v425_v9  ;;  %v571_v13 = vsel %vm368_vm0, %v748_v11, 0  ;;  %v744_v14 = vld [vmem:[%s918_s4 + $0x14] sm:$0xf]  ;;  %s868_s22 = scalar_lea.vmem %s914_s0, %s857_s17  ;;  %s335_s27 = scalar_lea.vmem %s915_s1, %s857_s17  ;;  %v750_v16 = vld [vmem:[%s918_s4 + $0x20] sm:$0xf]  ;;  %vm617_vm2 = vcmask 61440  }
  0x10   : > { %v503_v15 = vsel %vm368_vm0, %v744_v14, 0  ;;  %v362_v17 = vld [vmem:[%s868_s22] sm:$0x7]  ;;  %s340_s9 = scalar_lea.vmem %s916_s2, %s857_s17  ;;  %v601_v23 = vsel %vm368_vm0, %v750_v16, 0  ;;  %s345_s12 = scalar_lea.vmem %s917_s3, %s857_s17  ;;  %v762_v50 = vld [vmem:[%s868_s22] sm:$0x10] }
  0x11   : > { %480 = vmatpush.bf16.msrb.mxu0 %v471_v8  ;;  %512 = vmatpush.bf16.msrb.mxu1 %v503_v15  ;;  %v412_v18 = vunpack.c.l.b16 %v362_v17  ;;  %v386_v19 = vld [vmem:[%s335_s27] sm:$0x7]  ;;  %s733_s13 = sshll.u32 %s923_s25, 2  ;;  %s353_s21 = scalar_lea.vmem %s921_s7, %s857_s17 }
  0x12   : > { %580 = vmatpush.bf16.msrb.mxu3 %v571_v13  ;;  %735 = vmatmul.msk.bf16.vlgmr.msra.gmra.mxu0 %vm364_vm1, %v362_v17  ;;  %v553_v20 = vld [vmem:[%s335_s27] sm:$0xe]  ;;  %s349_s16 = scalar_lea.vmem %s920_s6, %s733_s13  ;;  %v771_v58 = vld [vmem:[%s919_s5] ss:$0 sm:$0xff] }
  0x13   : > { %546 = vmatpush.bf16.msrb.mxu2 %v537_v12  ;;  %737 = vmatmul.msk.bf16.vlgmr.msra.gmra.mxu1 %vm364_vm1, %v386_v19  ;;  %v557_v21 = vunpack.c.l.b16 %v553_v20  ;;  %v441_v22 = vld [vmem:[%s340_s9] sm:$0x7]  ;;  %v413_v24 = vpack.c.b16 %v412_v18, %v412_v18 }
  0x14   : > { %v519_v25 = vld [vmem:[%s868_s22] sm:$0xe]  ;;  %741 = vmatmul.msk.bf16.vlgmr.msra.gmra.mxu3 %vm364_vm1, %v441_v22  ;;  %v490_v26 = vunpack.c.l.b16 %v441_v22 }
  0x15   : > { %610 = vmatpush.bf16.msra.mxu0 %v601_v23  ;;  %v558_v27 = vpack.c.b16 %v557_v21, %v557_v21  ;;  %v415_v28 = vshrl.u32 %v413_v24, 16  ;;  %v417_v29 = vshll.u32 %v413_v24, 16  ;;  %v523_v31 = vunpack.c.l.b16 %v519_v25  ;;  %v464_v43 = vld [vmem:[%s345_s12] sm:$0x7] }
  0x16   : > { %v491_v30 = vpack.c.b16 %v490_v26, %v490_v26  ;;  %v753_v49 = vld [vmem:[%s868_s22] sm:$0xc] }
  0x17   : > { %v419_v32 = vrot.slane %v417_v29, 1  ;;  %v560_v33 = vshrl.u32 %v558_v27, 16  ;;  %v563_v34 = vshll.u32 %v558_v27, 16  ;;  %v524_v39 = vpack.c.b16 %v523_v31, %v523_v31  ;;  %v355_v56 = vld [vmem:[%s349_s16] sm:$0x7] }
  0x18   : > { %v495_v35 = vshll.u32 %v491_v30, 16  ;;  %v493_v37 = vshrl.u32 %v491_v30, 16  ;;  %v754_v52 = vor.u32 %v762_v50, %v753_v49  ;;  %v356_v57 = vunpack.c.l.bf16 %v355_v56 }
  0x19   : > { %v420_v36 = vor.u32 %v419_v32, %v415_v28  ;;  %v562_v40 = vrot.slane %v560_v33, 1  ;;  %v565_v41 = vrot.slane %v563_v34, 2  ;;  %v526_v45 = vshrl.u32 %v524_v39, 16 }
  0x1a   : > { %v497_v38 = vrot.slane %v495_v35, 1  ;;  %v529_v46 = vshll.u32 %v524_v39, 16  ;;  %v596_v53 = vrot.slane %v754_v52, 2  ;;  %v361_v61 = vadd.f32 %v771_v58, %v356_v57 }
  0x1b   : > { %739 = vmatmul.msk.bf16.vlgmr.msra.gmra.mxu2 %vm364_vm1, %v420_v36  ;;  %v566_v44 = vor.u32 %v565_v41, %v562_v40  ;;  %v528_v47 = vrot.slane %v526_v45, 1 }
  0x1c   : > { %v498_v42 = vor.u32 %v497_v38, %v493_v37  ;;  %v531_v48 = vrot.slane %v529_v46, 2 }
  0x1e   : > { %v532_v51 = vor.u32 %v531_v48, %v528_v47 }
  0x22   : > { %743 = vmatmul.msk.bf16.vlgmr.msrb.gmra.mxu0 %vm364_vm1, %v464_v43 }
  0x23   : > { %745 = vmatmul.msk.bf16.vlgmr.msrb.gmra.mxu1 %vm364_vm1, %v498_v42 }
  0x24   : > { %749 = vmatmul.msk.bf16.vlgmr.msrb.gmra.mxu3 %vm364_vm1, %v566_v44 }
  0x2b   : > { %747 = vmatmul.msk.bf16.vlgmr.msrb.gmra.mxu2 %vm364_vm1, %v532_v51 }
  0x32   : > { %755 = vmatmul.msk.bf16.vlgmr.msra.gmra.mxu0 %vm364_vm1, %v596_v53 }
  0x8f   : > { %v381_v54 = vpop.f32.mrf.mxu0 }
  0x90   : > { %v404_v55 = vpop.f32.mrf.mxu1  ;;  %v385_v63 = vadd.f32 %v381_v54, %v361_v61 }
  0x92   : > { %v408_v2 = vadd.f32 %v404_v55, %v385_v63 }
  0x97   : > { %v383_v59 = vpop.f32.mrf.mxu0  ;;  %v459_v60 = vpop.f32.mrf.mxu3 }
  0x98   : > { %v406_v62 = vpop.f32.mrf.mxu1 }
  0x9e   : > { %v436_v0 = vpop.f32.mrf.mxu2 }
  0x9f   : > { %v461_v1 = vpop.f32.mrf.mxu3  ;;  %v482_v3 = vpop.f32.mrf.mxu0  ;;  %v440_v5 = vadd.f32 %v436_v0, %v408_v2 }
  0xa0   : > { %v514_v4 = vpop.f32.mrf.mxu1 }
  0xa1   : > { %v463_v6 = vadd.f32 %v459_v60, %v440_v5 }
  0xa3   : > { %v486_v11 = vadd.f32 %v482_v3, %v463_v6 }
  0xa5   : > { %v518_v12 = vadd.f32 %v514_v4, %v486_v11 }
  0xa6   : > { %v438_v7 = vpop.f32.mrf.mxu2 }
  0xa7   : > { %v582_v8 = vpop.f32.mrf.mxu3  ;;  %v484_v9 = vpop.f32.mrf.mxu0 }
  0xa8   : > { %v516_v10 = vpop.f32.mrf.mxu1 }
  0xae   : > { %v548_v13 = vpop.f32.mrf.mxu2 }
  0xaf   : > { %v584_v14 = vpop.f32.mrf.mxu3  ;;  %v552_v15 = vadd.f32 %v548_v13, %v518_v12  ;;  %v612_v16 = vpop.f32.mrf.mxu0 }
  0xb1   : > { %v586_v17 = vadd.f32 %v582_v8, %v552_v15 }
  0xb3   : > { %v616_v18 = vadd.f32 %v612_v16, %v586_v17 }
  0xb5   : > { %618 = vst.msk [vmem:[%s353_s21] sm:$0x1f] %vm617_vm2, %v616_v18 }
  0xb6   : > { %v550_v19 = vpop.f32.mrf.mxu2 }
  0xb7   : > { %v614_v20 = vpop.f32.mrf.mxu0 }
  0xb8 PF: > { %s17_s24 = sadd.s32 1, %s778_s24  }
  0xb9   : > { %p14_p4 = scmp.ge.s32.totalorder %s17_s24, 4  }
  0xbb   :  { %16 = sbr.rel (!%p14_p4) target bundleno = 1 (0x1), region = 98 }

// kernel: pan_forward.7
= control target key start
LH: loop header
LB: loop body
LE: loop exit
PB: predicated region body
PF: predicated region fallthrough
CT: control target
= control target key end

     0   :  { %s750_s24 = smov 0   ;;  %s843_s0 = inlined_call_operand.vmem [shape: bf16[2,4,8], index: 0, kind: input, shape index: {}]   ;;  %s844_s1 = inlined_call_operand.vmem [shape: bf16[2,4,8], index: 1, kind: input, shape index: {}]   ;;  %s845_s2 = inlined_call_operand.vmem [shape: bf16[2,4,8], index: 2, kind: input, shape index: {}]   ;;  %s846_s3 = inlined_call_operand.vmem [shape: bf16[2,4,8], index: 3, kind: input, shape index: {}]   ;;  %s847_s4 = inlined_call_operand.vmem [shape: bf16[9,8,8], index: 4, kind: input, shape index: {}]   ;;  %s848_s5 = inlined_call_operand.vmem [shape: f32[1,8], index: 5, kind: input, shape index: {}]   ;;  %s849_s6 = inlined_call_operand.vmem [shape: bf16[2,1,8], index: 6, kind: input, shape index: {}]   ;;  %s850_s7 = inlined_call_operand.vmem [shape: f32[2,1,8], index: 7, kind: output, shape index: {}]  }
   0x1 LB: > { %s666_s25 = sadd.s32 4294967295, %s708_s24   ;;  %p670_p0 = scmp.ge.s32.totalorder %s708_s24, 1  ;;  %s708_s24 = sphi %s750_s24, %s17_s24  }
   0x2   : > { %p271_p1 = scmp.lt.s32.totalorder %s708_s24, 3 }
   0x4   : > { %p272_p2 = pnand %p670_p0, %p271_p1 }
   0x5   : > { %p315_p3 = scmp.lt.s32.totalorder (!%p272_p2), %s666_s25, 1 }
   0x6   : > { %275 = sbr.rel (%p272_p2) target bundleno = 195 (0xc3), region = 48 }
   0xb   : > { %v343_v0 = vld [vmem:[%s847_s4] sm:$0xf]  ;;  %vm348_vm0 = vcmask 1043456   ;;  %v676_v1 = vld [vmem:[%s847_s4 + $0x4] sm:$0xf]  ;;  %s852_s25 = smov (!%p315_p3, %s666_s25), 1 }
   0xc   : > { %v350_v2 = vsel %vm348_vm0, %v343_v0, 0  ;;  %v373_v3 = vsel %vm348_vm0, %v676_v1, 0  ;;  %v678_v4 = vld [vmem:[%s847_s4 + $0x8] sm:$0xf]  ;;  %v680_v6 = vld [vmem:[%s847_s4 + $0xc] sm:$0xf]  ;;  %s333_s15 = scalar_lea.vmem %s849_s6, %s852_s25  ;;  %s336_s20 = scalar_lea.vmem %s850_s7, %s852_s25 }
   0xd   : > { %359 = vmatpush.bf16.msra.mxu0 %v350_v2  ;;  %382 = vmatpush.bf16.msra.mxu1 %v373_v3  ;;  %v399_v5 = vsel %vm348_vm0, %v678_v4, 0  ;;  %v682_v7 = vld [vmem:[%s847_s4 + $0x10] sm:$0xf]  ;;  %v422_v8 = vsel %vm348_vm0, %v680_v6, 0  ;;  %v684_v10 = vld [vmem:[%s847_s4 + $0x14] sm:$0xf] }
   0xe   : > { %408 = vmatpush.bf16.msra.mxu2 %v399_v5  ;;  %v445_v9 = vsel %vm348_vm0, %v682_v7, 0  ;;  %v686_v11 = vld [vmem:[%s847_s4 + $0x18] sm:$0xf]  ;;  %s787_s17 = sshll.u32 %s852_s25, 1  ;;  %vm344_vm1 = vcmask 64512   ;;  %431 = vmatpush.bf16.msra.mxu3 %v422_v8  ;;  %v471_v12 = vsel %vm348_vm0, %v684_v10, 0 }
   0xf   : > { %v499_v13 = vsel %vm348_vm0, %v686_v11, 0  ;;  %v688_v14 = vld [vmem:[%s847_s4 + $0x1c] sm:$0xf]  ;;  %s798_s22 = scalar_lea.vmem %s843_s0, %s787_s17  ;;  %s322_s27 = scalar_lea.vmem %s844_s1, %s787_s17  ;;  %v690_v16 = vld [vmem:[%s847_s4 + $0x20] sm:$0xf]  ;;  %vm572_vm2 = vcmask 57344  }
  0x10   : > { %v527_v15 = vsel %vm348_vm0, %v688_v14, 0  ;;  %v342_v17 = vld [vmem:[%s798_s22] sm:$0x1]  ;;  %s326_s9 = scalar_lea.vmem %s845_s2, %s787_s17  ;;  %v556_v20 = vsel %vm348_vm0, %v690_v16, 0  ;;  %s330_s12 = scalar_lea.vmem %s846_s3, %s787_s17  ;;  %v487_v23 = vld [vmem:[%s798_s22] sm:$0x2] }
  0x11   : > { %454 = vmatpush.bf16.msrb.mxu0 %v445_v9  ;;  %480 = vmatpush.bf16.msrb.mxu1 %v471_v12  ;;  %391 = vst [vmem:[#allocation1] ss:$4 sm:$0xff] %v342_v17  ;;  %v366_v18 = vld [vmem:[%s322_s27] sm:$0x1]  ;;  %v515_v27 = vld [vmem:[%s322_s27] sm:$0x2] }
  0x12   : > { %508 = vmatpush.bf16.msrb.mxu2 %v499_v13  ;;  %536 = vmatpush.bf16.msrb.mxu3 %v527_v15  ;;  %v415_v19 = vld [vmem:[%s326_s9] sm:$0x1]  ;;  %v543_v30 = vld [vmem:[%s798_s22] sm:$0x2] }
  0x13   : > { %675 = vmatmul.msk.bf16.vlgmr.msra.gmra.mxu0 %vm344_vm1, %v342_v17  ;;  %677 = vmatmul.msk.bf16.vlgmr.msra.gmra.mxu1 %vm344_vm1, %v366_v18  ;;  %v438_v24 = vld [vmem:[%s330_s12] sm:$0x1] }
  0x14   : > { %681 = vmatmul.msk.bf16.vlgmr.msra.gmra.mxu3 %vm344_vm1, %v415_v19  ;;  %v338_v38 = vld [vmem:[%s333_s15] sm:$0x1] }
  0x15   : > { %565 = vmatpush.bf16.msra.mxu0 %v556_v20  ;;  %v339_v42 = vunpack.c.l.bf16 %v338_v38  ;;  %v340_v43 = vld [vmem:[%s848_s5] sm:$0x1] }
  0x17   : > { %v341_v44 = vadd.f32 %v340_v43, %v339_v42 }
  0x18   : > { %v392_v21 = vld.sshfl [vmem:[#allocation1] sm:$0xff pattern:$0x73625140] }
  0x19   : > { %v393_v22 = vshrl.u32 %v392_v21, 16  ;;  %463 = vst [vmem:[#allocation1] ss:$4 sm:$0xff] %v415_v19 }
  0x1b   : > { %679 = vmatmul.msk.bf16.vlgmr.msra.gmra.mxu2 %vm344_vm1, %v393_v22 }
  0x20   : > { %v464_v25 = vld.sshfl [vmem:[#allocation1] sm:$0xff pattern:$0x73625140] }
  0x21   : > { %491 = vst [vmem:[#allocation1] ss:$4 sm:$0xff] %v487_v23  ;;  %v465_v26 = vshrl.u32 %v464_v25, 16 }
  0x23   : > { %683 = vmatmul.msk.bf16.vlgmr.msrb.gmra.mxu0 %vm344_vm1, %v438_v24  ;;  %685 = vmatmul.msk.bf16.vlgmr.msrb.gmra.mxu1 %vm344_vm1, %v465_v26 }
  0x28   : > { %v492_v28 = vld.sshfl [vmem:[#allocation1] sm:$0xff pattern:$0x73625140] }
  0x29   : > { %v494_v29 = vrot.slane %v492_v28, 1  ;;  %519 = vst [vmem:[#allocation1] ss:$4 sm:$0xff] %v515_v27 }
  0x2b   : > { %687 = vmatmul.msk.bf16.vlgmr.msrb.gmra.mxu2 %vm344_vm1, %v494_v29 }
  0x30   : > { %v520_v31 = vld.sshfl [vmem:[#allocation1] sm:$0xff pattern:$0x73625140] }
  0x31   : > { %v522_v32 = vrot.slane %v520_v31, 1  ;;  %547 = vst [vmem:[#allocation1] ss:$4 sm:$0xff] %v543_v30 }
  0x33   : > { %689 = vmatmul.msk.bf16.vlgmr.msrb.gmra.mxu3 %vm344_vm1, %v522_v32 }
  0x38   : > { %v548_v33 = vld.sshfl [vmem:[#allocation1] sm:$0xff pattern:$0x73625140] }
  0x39   : > { %v549_v34 = vshrl.u32 %v548_v33, 16 }
  0x3b   : > { %v551_v35 = vrot.slane %v549_v34, 1 }
  0x3d   : > { %691 = vmatmul.msk.bf16.vlgmr.msra.gmra.mxu0 %vm344_vm1, %v551_v35 }
  0x90   : > { %v361_v36 = vpop.f32.mrf.mxu0  ;;  %v384_v37 = vpop.f32.mrf.mxu1 }
  0x91   : > { %v365_v49 = vadd.f32 %v361_v36, %v341_v44 }
  0x93   : > { %v388_v50 = vadd.f32 %v384_v37, %v365_v49 }
  0x97   : > { %v433_v41 = vpop.f32.mrf.mxu3 }
  0x98   : > { %v363_v39 = vpop.f32.mrf.mxu0  ;;  %v386_v40 = vpop.f32.mrf.mxu1 }
  0x9e   : > { %v410_v45 = vpop.f32.mrf.mxu2 }
  0x9f   : > { %v435_v47 = vpop.f32.mrf.mxu3  ;;  %v414_v54 = vadd.f32 %v410_v45, %v388_v50 }
  0xa0   : > { %v456_v46 = vpop.f32.mrf.mxu0  ;;  %v482_v48 = vpop.f32.mrf.mxu1 }
  0xa1   : > { %v437_v55 = vadd.f32 %v433_v41, %v414_v54 }
  0xa3   : > { %v460_v57 = vadd.f32 %v456_v46, %v437_v55 }
  0xa5   : > { %v486_v58 = vadd.f32 %v482_v48, %v460_v57 }
  0xa6   : > { %v412_v51 = vpop.f32.mrf.mxu2 }
  0xa8   : > { %v458_v52 = vpop.f32.mrf.mxu0  ;;  %v484_v53 = vpop.f32.mrf.mxu1 }
  0xae   : > { %v510_v56 = vpop.f32.mrf.mxu2 }
  0xaf   : > { %v514_v61 = vadd.f32 %v510_v56, %v486_v58 }
  0xb6   : > { %v538_v59 = vpop.f32.mrf.mxu3  ;;  %v512_v60 = vpop.f32.mrf.mxu2 }
  0xb7   : > { %v542_v62 = vadd.f32 %v538_v59, %v514_v61 }
  0xba   : > { %v567_v63 = vpop.f32.mrf.mxu0 }
  0xbb   : > { %v571_v0 = vadd.f32 %v567_v63, %v542_v62 }
  0xbd   : > { %573 = vst.msk [vmem:[%s336_s20] sm:$0x1] %vm572_vm2, %v571_v0 }
  0xbe   : > { %v540_v1 = vpop.f32.mrf.mxu3 }
  0xc2   : > { %v569_v2 = vpop.f32.mrf.mxu0 }
  0xc3 PF: > { %s17_s24 = sadd.s32 1, %s708_s24  }
  0xc4   : > { %p14_p4 = scmp.ge.s32.totalorder %s17_s24, 4  }
  0xc6   :  { %16 = sbr.rel (!%p14_p4) target bundleno = 1 (0x1), region = 98 }

</bundles_post_ra>
